<compile_context>
chip_gen: v5e
topology: v5e:2x2
jax: 0.10.0
libtpu: 0.0.40
codegen_flags: <defaults>
</compile_context>

<pallas_src>
import jax
import jax.numpy as jnp
from jax.experimental import pallas as pl
from jax.experimental.pallas import tpu as pltpu

EPS_GAC = 1e-5
BN_EPS = 1e-5

# branch indices into the stacked weight arrays
LOCAL, GLOBAL, LOCAL2 = 0, 1, 2


# --------------------- shared forward math (kernel + ref) -------------------
def _forward_block(x1_in, x2_in, alpha, gamma, beta, w1s, b1s, w2s, b2s,
                   out_dtype):
    """CrossCoAttention forward on one (nb, C, HW) block.

    Fully vectorized over the sample axis (no per-sample unroll):
      * elementwise math / per-sample reductions broadcast over axis 0,
      * 1x1-conv matmuls run as one batched MXU contraction per branch
        (weights broadcast over nb).
    Reductions & gating in f32; matmul operands bf16 with f32 accumulation.
    """
    x1 = x1_in.astype(jnp.float32)                       # (nb, C, HW)
    x2 = x2_in.astype(jnp.float32)

    def gac_gate(x):                                     # -> (nb, C, 1)
        nl = jnp.sum(x * x, axis=-1, keepdims=True) + EPS_GAC
        glo = jnp.sqrt(nl) * alpha
        cal = gamma * jax.lax.rsqrt(
            jnp.mean(glo * glo, axis=1, keepdims=True) + EPS_GAC)
        return 1.0 + jnp.tanh(glo * cal + beta)

    a1 = x1 * gac_gate(x1)                               # (nb, C, HW) f32
    a2 = x2 * gac_gate(x2)
    d = a1 - a2                                          # hoisted, reused

    def bmm(w, x):        # (Ko, Ki) x (nb, Ki, S) -> (nb, Ko, S) on the MXU
        nb = x.shape[0]
        wb = jnp.broadcast_to(w[None], (nb,) + w.shape)  # tiny weight bcast
        return jax.lax.dot_general(
            wb, x.astype(jnp.bfloat16),
            dimension_numbers=(((2,), (1,)), ((0,), (0,))),
            preferred_element_type=jnp.float32)

    def branch(x, i):     # conv1x1 -> (folded BN) -> ReLU -> conv1x1 -> BN
        h = jnp.maximum(bmm(w1s[i], x) + b1s[i], 0.0)    # (nb, CI, S)
        return bmm(w2s[i], h) + b2s[i]                   # (nb, C, S)

    # ---- GAF stage 1 ----
    xa = a1 + a2
    # The GLOBAL branch is only ~C*CI MACs/sample; it stays as one tiny
    # batched matrix-vector op per grid step (MXU otherwise idle there).
    wei = jax.nn.sigmoid(
        branch(xa, LOCAL)
        + branch(jnp.mean(xa, axis=-1, keepdims=True), GLOBAL))
    xi = a2 + d * wei                                    # a1*wei + a2*(1-wei)

    # ---- GAF stage 2 (global_att reused; global_att2 unused, as in PyTorch)
    wei2 = jax.nn.sigmoid(
        branch(xi, LOCAL2)
        + branch(jnp.mean(xi, axis=-1, keepdims=True), GLOBAL))
    return (a2 + d * wei2).astype(out_dtype)


# ------------------------------- kernel -------------------------------------
def crossco_kernel(f1_ref, f2_ref, gac_ref, w1s_ref, b1s_ref, w2s_ref,
                   b2s_ref, o_ref):
    o_ref[...] = _forward_block(
        f1_ref[...], f2_ref[...],
        gac_ref[0], gac_ref[1], gac_ref[2],              # alpha, gamma, beta
        w1s_ref[...], b1s_ref[...], w2s_ref[...], b2s_ref[...],
        o_ref.dtype)


# --------------------------- parameter handling ------------------------------
def fold_conv_bn(conv_w, conv_b, gamma, beta, mean, var):
    """Fold eval-mode BN into a 1x1 conv; keeps (Cout, Cin) orientation."""
    scale = gamma / jnp.sqrt(var + BN_EPS)               # (Cout,)
    w = conv_w * scale[:, None]                          # (Cout, Cin)
    b = (conv_b - mean) * scale + beta                   # (Cout,)
    return w, b


def _fold_seq(seq):
    w1, b1 = fold_conv_bn(seq['w1'], seq['b1'], **seq['bn1'])
    w2, b2 = fold_conv_bn(seq['w2'], seq['b2'], **seq['bn2'])
    return w1, b1, w2, b2


def _pack_branches(params):
    folded = [_fold_seq(params['local']),
              _fold_seq(params['glob']),
              _fold_seq(params['local2'])]
    # bf16 weights (MXU-native, halves weight DMA); biases stay f32.
    w1s = jnp.stack([f[0] for f in folded]).astype(jnp.bfloat16)  # (3, CI, C)
    b1s = jnp.stack([f[1] for f in folded])[..., None]            # (3, CI, 1)
    w2s = jnp.stack([f[2] for f in folded]).astype(jnp.bfloat16)  # (3, C, CI)
    b2s = jnp.stack([f[3] for f in folded])[..., None]            # (3, C, 1)
    return w1s, b1s, w2s, b2s


def _pack_gac(params):
    # single (3, C, 1) array: alpha / gamma / beta
    return jnp.stack([params['alpha'], params['gamma'],
                      params['beta']])[..., None]


def init_params(key, C, r=4):
    CI = C // r
    ks = jax.random.split(key, 6)

    def conv(k, cout, cin):
        return 0.2 * jax.random.normal(k, (cout, cin), jnp.float32)

    def bias(k, cout):
        return 0.1 * jax.random.normal(k, (cout,), jnp.float32)

    def bn(c):  # PyTorch BatchNorm2d defaults (eval mode)
        return dict(gamma=jnp.ones((c,), jnp.float32),
                    beta=jnp.zeros((c,), jnp.float32),
                    mean=jnp.zeros((c,), jnp.float32),
                    var=jnp.ones((c,), jnp.float32))

    def seq(k):
        k1, k2, k3, k4 = jax.random.split(k, 4)
        return dict(w1=conv(k1, CI, C), b1=bias(k2, CI), bn1=bn(CI),
                    w2=conv(k3, C, CI), b2=bias(k4, C), bn2=bn(C))

    # GAC __init__ uses alpha=1, gamma=0, beta=0; small random perturbations
    # are used here so the tanh/gating path is actually exercised.
    return dict(
        alpha=1.0 + 0.1 * jax.random.normal(ks[0], (C,), jnp.float32),
        gamma=0.1 * jax.random.normal(ks[1], (C,), jnp.float32),
        beta=0.1 * jax.random.normal(ks[2], (C,), jnp.float32),
        local=seq(ks[3]),
        glob=seq(ks[4]),
        local2=seq(ks[5]),
    )


# ------------------------------- wrapper -------------------------------------
def _vmem_capacity_bytes():
    try:
        return int(pltpu.get_tpu_info().vmem_capacity_bytes)
    except Exception:
        return 64 << 20      # conservative (v7x-sized) fallback


def _pick_block_batch(N, per_sample_bytes, budget_bytes, min_steps):
    """Largest divisor of N whose block working set stays under budget while
    leaving at least `min_steps` grid steps (whenever N allows it)."""
    nb = 1
    for cand in range(1, N + 1):
        if N % cand:
            continue
        if cand * per_sample_bytes > budget_bytes:
            break
        if N // cand < min(min_steps, N):
            break
        nb = cand
    return nb


def _full_spec(shape):
    nd = len(shape)
    return pl.BlockSpec(shape, lambda n, _nd=nd: (0,) * _nd)


@jax.jit
def cross_co_attention(f1_nchw, f2_nchw, params):
    N, C, H, W = f1_nchw.shape
    HW = H * W
    # Free reshape (no transpose): channels-first, spatial flattened; HW is
    # the lane dimension inside the kernel (lane-dense loads/stores).
    f1 = f1_nchw.reshape(N, C, HW)
    f2 = f2_nchw.reshape(N, C, HW)

    w1s, b1s, w2s, b2s = _pack_branches(params)
    CI = w1s.shape[1]
    gac = _pack_gac(params)                          # (3, C, 1)

    # ---- generation-aware VMEM limit & block-batch selection ----
    vmem_cap = _vmem_capacity_bytes()
    # headroom for compiler scratch: ~48 MiB on 64 MiB/core (v7x-class),
    # ~112 MiB on 128 MiB/core (v5e/v6e) parts.
    vmem_limit = int(min(max(vmem_cap - (16 << 20), 32 << 20), 112 << 20))
    two_tc = vmem_cap <= (64 << 20)                  # v7x proxy: 2 TCs
    min_steps = 4 if two_tc else 1                   # >= 2 steps per core

    # per-sample working set: double-buffered I/O blocks (2 in + 1 out) plus
    # ~8 live f32 (C, HW) intermediates inside the fused body
    itemsize = f1.dtype.itemsize
    per_sample = C * HW * (2 * 3 * itemsize + 8 * 4)
    nb = _pick_block_batch(N, per_sample, vmem_limit // 2, min_steps)
    grid = (N // nb,)

    # TODO(synk): when a single sample's C*HW working set exceeds the VMEM
    # budget (notably on v7x), add a second 'arbitrary' grid axis tiling HW
    # with a 3-pass scratch-carried structure (sum-x^2 / wei+sum-xi / wei2).
    in_specs = [
        pl.BlockSpec((nb, C, HW), lambda n: (n, 0, 0)),   # f1
        pl.BlockSpec((nb, C, HW), lambda n: (n, 0, 0)),   # f2
        _full_spec((3, C, 1)),                            # GAC alpha/gamma/beta
        _full_spec((3, CI, C)), _full_spec((3, CI, 1)),   # conv1 w/b (BN folded)
        _full_spec((3, C, CI)), _full_spec((3, C, 1)),    # conv2 w/b (BN folded)
    ]

    out = pl.pallas_call(
        crossco_kernel,
        out_shape=jax.ShapeDtypeStruct((N, C, HW), f1_nchw.dtype),
        grid=grid,
        in_specs=in_specs,
        out_specs=pl.BlockSpec((nb, C, HW), lambda n: (n, 0, 0)),
        compiler_params=pltpu.CompilerParams(
            dimension_semantics=("parallel",),
            vmem_limit_bytes=vmem_limit),
    )(f1, f2, gac, w1s, b1s, w2s, b2s)

    return out.reshape(N, C, H, W)


# --------------------------- pure-JAX reference -------------------------------
def reference(f1_nchw, f2_nchw, params):
    """Mirror of the PyTorch module (eval-mode BN folded) using the exact same
    math/precision policy as the kernel via the shared _forward_block."""
    N, C, H, W = f1_nchw.shape
    HW = H * W
    w1s, b1s, w2s, b2s = _pack_branches(params)
    gac = _pack_gac(params)
    out = _forward_block(f1_nchw.reshape(N, C, HW), f2_nchw.reshape(N, C, HW),
                         gac[0], gac[1], gac[2],
                         w1s, b1s, w2s, b2s, f1_nchw.dtype)
    return out.reshape(N, C, H, W)


if __name__ == "__main__":
    N, C, H, W = 4, 32, 16, 16          # HW = 256 -> lane-dense blocks
    key = jax.random.PRNGKey(0)
    k1, k2, kp = jax.random.split(key, 3)
    # bf16 HBM streams (perf feedback): the kernel upcasts to f32 internally.
    f1 = jax.random.normal(k1, (N, C, H, W), jnp.float32).astype(jnp.bfloat16)
    f2 = jax.random.normal(k2, (N, C, H, W), jnp.float32).astype(jnp.bfloat16)
    params = init_params(kp, C, r=4)

    out = jax.block_until_ready(cross_co_attention(f1, f2, params))
    ref = jax.block_until_ready(reference(f1, f2, params))

    assert out.shape == (N, C, H, W) and out.dtype == f1.dtype
    ok = jnp.allclose(out.astype(jnp.float32), ref.astype(jnp.float32),
                      atol=3e-2, rtol=2e-2)
    assert bool(ok), "mismatch vs reference"
    print("KERNEL_OK")
</pallas_src>

<mosaic_0001>
module attributes {stable_mosaic.version = 11 : i64} {
  func.func @crossco_kernel(%arg0: i32, %arg1: memref<1x32x256xbf16, #tpu.memory_space<vmem>>, %arg2: memref<1x32x256xbf16, #tpu.memory_space<vmem>>, %arg3: memref<3x32x1xf32, #tpu.memory_space<vmem>>, %arg4: memref<3x8x32xbf16, #tpu.memory_space<vmem>>, %arg5: memref<3x8x1xf32, #tpu.memory_space<vmem>>, %arg6: memref<3x32x8xbf16, #tpu.memory_space<vmem>>, %arg7: memref<3x32x1xf32, #tpu.memory_space<vmem>>, %arg8: memref<1x32x256xbf16, #tpu.memory_space<vmem>>) attributes {dimension_semantics = [#tpu.dimension_semantics<parallel>], iteration_bounds = array<i64: 4>, scalar_prefetch = 0 : i64, scratch_operands = 0 : i64, tpu.core_type = #tpu.core_type<tc>, window_params = [{transform_indices = @transform_0, window_bounds = array<i64: 1, 32, 256>}, {transform_indices = @transform_1, window_bounds = array<i64: 1, 32, 256>}, {pipeline_mode = #tpu.pipeline_mode<synchronous>, transform_indices = @transform_2, window_bounds = array<i64: 3, 32, 1>}, {pipeline_mode = #tpu.pipeline_mode<synchronous>, transform_indices = @transform_3, window_bounds = array<i64: 3, 8, 32>}, {pipeline_mode = #tpu.pipeline_mode<synchronous>, transform_indices = @transform_4, window_bounds = array<i64: 3, 8, 1>}, {pipeline_mode = #tpu.pipeline_mode<synchronous>, transform_indices = @transform_5, window_bounds = array<i64: 3, 32, 8>}, {pipeline_mode = #tpu.pipeline_mode<synchronous>, transform_indices = @transform_6, window_bounds = array<i64: 3, 32, 1>}, {transform_indices = @transform_7, window_bounds = array<i64: 1, 32, 256>}]} {
    %c0 = arith.constant 0 : index
    %c0_0 = arith.constant 0 : index
    %c0_1 = arith.constant 0 : index
    %0 = vector.load %arg1[%c0, %c0_0, %c0_1] : memref<1x32x256xbf16, #tpu.memory_space<vmem>>, vector<1x32x256xbf16>
    %c0_2 = arith.constant 0 : index
    %c0_3 = arith.constant 0 : index
    %c0_4 = arith.constant 0 : index
    %1 = vector.load %arg2[%c0_2, %c0_3, %c0_4] : memref<1x32x256xbf16, #tpu.memory_space<vmem>>, vector<1x32x256xbf16>
    %c0_5 = arith.constant 0 : index
    %c0_6 = arith.constant 0 : index
    %c0_7 = arith.constant 0 : index
    %2 = vector.load %arg3[%c0_5, %c0_6, %c0_7] : memref<3x32x1xf32, #tpu.memory_space<vmem>>, vector<1x32x1xf32>
    %3 = vector.shape_cast %2 : vector<1x32x1xf32> to vector<32x1xf32>
    %c1 = arith.constant 1 : index
    %c0_8 = arith.constant 0 : index
    %c0_9 = arith.constant 0 : index
    %4 = vector.load %arg3[%c1, %c0_8, %c0_9] : memref<3x32x1xf32, #tpu.memory_space<vmem>>, vector<1x32x1xf32>
    %5 = vector.shape_cast %4 : vector<1x32x1xf32> to vector<32x1xf32>
    %c2 = arith.constant 2 : index
    %c0_10 = arith.constant 0 : index
    %c0_11 = arith.constant 0 : index
    %6 = vector.load %arg3[%c2, %c0_10, %c0_11] : memref<3x32x1xf32, #tpu.memory_space<vmem>>, vector<1x32x1xf32>
    %7 = vector.shape_cast %6 : vector<1x32x1xf32> to vector<32x1xf32>
    %c0_12 = arith.constant 0 : index
    %c0_13 = arith.constant 0 : index
    %c0_14 = arith.constant 0 : index
    %8 = vector.load %arg4[%c0_12, %c0_13, %c0_14] : memref<3x8x32xbf16, #tpu.memory_space<vmem>>, vector<3x8x32xbf16>
    %c0_15 = arith.constant 0 : index
    %c0_16 = arith.constant 0 : index
    %c0_17 = arith.constant 0 : index
    %9 = vector.load %arg5[%c0_15, %c0_16, %c0_17] : memref<3x8x1xf32, #tpu.memory_space<vmem>>, vector<3x8x1xf32>
    %c0_18 = arith.constant 0 : index
    %c0_19 = arith.constant 0 : index
    %c0_20 = arith.constant 0 : index
    %10 = vector.load %arg6[%c0_18, %c0_19, %c0_20] : memref<3x32x8xbf16, #tpu.memory_space<vmem>>, vector<3x32x8xbf16>
    %c0_21 = arith.constant 0 : index
    %c0_22 = arith.constant 0 : index
    %c0_23 = arith.constant 0 : index
    %11 = vector.load %arg7[%c0_21, %c0_22, %c0_23] : memref<3x32x1xf32, #tpu.memory_space<vmem>>, vector<3x32x1xf32>
    %12 = arith.extf %0 : vector<1x32x256xbf16> to vector<1x32x256xf32>
    %13 = arith.extf %1 : vector<1x32x256xbf16> to vector<1x32x256xf32>
    %14 = arith.mulf %12, %12 : vector<1x32x256xf32>
    %cst = arith.constant dense<0.000000e+00> : vector<1x32xf32>
    %15 = vector.multi_reduction <add>, %14, %cst [2] : vector<1x32x256xf32> to vector<1x32xf32>
    %16 = vector.shape_cast %15 : vector<1x32xf32> to vector<1x32x1xf32>
    %cst_24 = arith.constant 9.99999974E-6 : f32
    %17 = vector.broadcast %cst_24 : f32 to vector<1x32x1xf32>
    %18 = arith.addf %16, %17 : vector<1x32x1xf32>
    %19 = math.sqrt %18 : vector<1x32x1xf32>
    %20 = vector.shape_cast %3 : vector<32x1xf32> to vector<1x32x1xf32>
    %21 = arith.mulf %19, %20 : vector<1x32x1xf32>
    %22 = arith.mulf %21, %21 : vector<1x32x1xf32>
    %cst_25 = arith.constant dense<0.000000e+00> : vector<1x1xf32>
    %23 = vector.multi_reduction <add>, %22, %cst_25 [1] : vector<1x32x1xf32> to vector<1x1xf32>
    %24 = vector.shape_cast %23 : vector<1x1xf32> to vector<1x1x1xf32>
    %cst_26 = arith.constant 3.200000e+01 : f32
    %25 = vector.broadcast %cst_26 : f32 to vector<1x1x1xf32>
    %26 = arith.divf %24, %25 : vector<1x1x1xf32>
    %cst_27 = arith.constant 9.99999974E-6 : f32
    %27 = vector.broadcast %cst_27 : f32 to vector<1x1x1xf32>
    %28 = arith.addf %26, %27 : vector<1x1x1xf32>
    %29 = math.rsqrt %28 : vector<1x1x1xf32>
    %30 = vector.shape_cast %5 : vector<32x1xf32> to vector<1x32x1xf32>
    %31 = vector.broadcast %29 : vector<1x1x1xf32> to vector<1x32x1xf32>
    %32 = arith.mulf %30, %31 : vector<1x32x1xf32>
    %33 = arith.mulf %21, %32 : vector<1x32x1xf32>
    %34 = vector.shape_cast %7 : vector<32x1xf32> to vector<1x32x1xf32>
    %35 = arith.addf %33, %34 : vector<1x32x1xf32>
    %36 = math.tanh %35 : vector<1x32x1xf32>
    %cst_28 = arith.constant 1.000000e+00 : f32
    %37 = vector.broadcast %cst_28 : f32 to vector<1x32x1xf32>
    %38 = arith.addf %37, %36 : vector<1x32x1xf32>
    %39 = vector.broadcast %38 : vector<1x32x1xf32> to vector<1x32x256xf32>
    %40 = arith.mulf %12, %39 : vector<1x32x256xf32>
    %41 = arith.mulf %13, %13 : vector<1x32x256xf32>
    %cst_29 = arith.constant dense<0.000000e+00> : vector<1x32xf32>
    %42 = vector.multi_reduction <add>, %41, %cst_29 [2] : vector<1x32x256xf32> to vector<1x32xf32>
    %43 = vector.shape_cast %42 : vector<1x32xf32> to vector<1x32x1xf32>
    %cst_30 = arith.constant 9.99999974E-6 : f32
    %44 = vector.broadcast %cst_30 : f32 to vector<1x32x1xf32>
    %45 = arith.addf %43, %44 : vector<1x32x1xf32>
    %46 = math.sqrt %45 : vector<1x32x1xf32>
    %47 = vector.shape_cast %3 : vector<32x1xf32> to vector<1x32x1xf32>
    %48 = arith.mulf %46, %47 : vector<1x32x1xf32>
    %49 = arith.mulf %48, %48 : vector<1x32x1xf32>
    %cst_31 = arith.constant dense<0.000000e+00> : vector<1x1xf32>
    %50 = vector.multi_reduction <add>, %49, %cst_31 [1] : vector<1x32x1xf32> to vector<1x1xf32>
    %51 = vector.shape_cast %50 : vector<1x1xf32> to vector<1x1x1xf32>
    %cst_32 = arith.constant 3.200000e+01 : f32
    %52 = vector.broadcast %cst_32 : f32 to vector<1x1x1xf32>
    %53 = arith.divf %51, %52 : vector<1x1x1xf32>
    %cst_33 = arith.constant 9.99999974E-6 : f32
    %54 = vector.broadcast %cst_33 : f32 to vector<1x1x1xf32>
    %55 = arith.addf %53, %54 : vector<1x1x1xf32>
    %56 = math.rsqrt %55 : vector<1x1x1xf32>
    %57 = vector.shape_cast %5 : vector<32x1xf32> to vector<1x32x1xf32>
    %58 = vector.broadcast %56 : vector<1x1x1xf32> to vector<1x32x1xf32>
    %59 = arith.mulf %57, %58 : vector<1x32x1xf32>
    %60 = arith.mulf %48, %59 : vector<1x32x1xf32>
    %61 = vector.shape_cast %7 : vector<32x1xf32> to vector<1x32x1xf32>
    %62 = arith.addf %60, %61 : vector<1x32x1xf32>
    %63 = math.tanh %62 : vector<1x32x1xf32>
    %cst_34 = arith.constant 1.000000e+00 : f32
    %64 = vector.broadcast %cst_34 : f32 to vector<1x32x1xf32>
    %65 = arith.addf %64, %63 : vector<1x32x1xf32>
    %66 = vector.broadcast %65 : vector<1x32x1xf32> to vector<1x32x256xf32>
    %67 = arith.mulf %13, %66 : vector<1x32x256xf32>
    %68 = arith.subf %40, %67 : vector<1x32x256xf32>
    %69 = arith.addf %40, %67 : vector<1x32x256xf32>
    %70 = vector.extract_strided_slice %8 {offsets = [0, 0, 0], sizes = [1, 8, 32], strides = [1, 1, 1]} : vector<3x8x32xbf16> to vector<1x8x32xbf16>
    %71 = vector.shape_cast %70 : vector<1x8x32xbf16> to vector<8x32xbf16>
    %72 = vector.shape_cast %71 : vector<8x32xbf16> to vector<1x8x32xbf16>
    %73 = arith.truncf %69 : vector<1x32x256xf32> to vector<1x32x256xbf16>
    %cst_35 = arith.constant dense<0.000000e+00> : vector<1x8x256xf32>
    %74 = tpu.matmul %72, %73, %cst_35 {dimension_numbers = #tpu.dot_dimension_numbers<[2], [1], [1], [2], [0, 0, 0, 1, 1, 2], [0], [0]>} : vector<1x8x32xbf16>, vector<1x32x256xbf16>, vector<1x8x256xf32> -> vector<1x8x256xf32>
    %75 = vector.extract_strided_slice %9 {offsets = [0, 0, 0], sizes = [1, 8, 1], strides = [1, 1, 1]} : vector<3x8x1xf32> to vector<1x8x1xf32>
    %76 = vector.shape_cast %75 : vector<1x8x1xf32> to vector<8x1xf32>
    %77 = vector.shape_cast %76 : vector<8x1xf32> to vector<1x8x1xf32>
    %78 = vector.broadcast %77 : vector<1x8x1xf32> to vector<1x8x256xf32>
    %79 = arith.addf %74, %78 : vector<1x8x256xf32>
    %cst_36 = arith.constant 0.000000e+00 : f32
    %80 = vector.broadcast %cst_36 : f32 to vector<1x8x256xf32>
    %81 = arith.maximumf %79, %80 : vector<1x8x256xf32>
    %82 = vector.extract_strided_slice %10 {offsets = [0, 0, 0], sizes = [1, 32, 8], strides = [1, 1, 1]} : vector<3x32x8xbf16> to vector<1x32x8xbf16>
    %83 = vector.shape_cast %82 : vector<1x32x8xbf16> to vector<32x8xbf16>
    %84 = vector.shape_cast %83 : vector<32x8xbf16> to vector<1x32x8xbf16>
    %85 = arith.truncf %81 : vector<1x8x256xf32> to vector<1x8x256xbf16>
    %cst_37 = arith.constant dense<0.000000e+00> : vector<1x32x256xf32>
    %86 = tpu.matmul %84, %85, %cst_37 {dimension_numbers = #tpu.dot_dimension_numbers<[2], [1], [1], [2], [0, 0, 0, 1, 1, 2], [0], [0]>} : vector<1x32x8xbf16>, vector<1x8x256xbf16>, vector<1x32x256xf32> -> vector<1x32x256xf32>
    %87 = vector.extract_strided_slice %11 {offsets = [0, 0, 0], sizes = [1, 32, 1], strides = [1, 1, 1]} : vector<3x32x1xf32> to vector<1x32x1xf32>
    %88 = vector.shape_cast %87 : vector<1x32x1xf32> to vector<32x1xf32>
    %89 = vector.shape_cast %88 : vector<32x1xf32> to vector<1x32x1xf32>
    %90 = vector.broadcast %89 : vector<1x32x1xf32> to vector<1x32x256xf32>
    %91 = arith.addf %86, %90 : vector<1x32x256xf32>
    %cst_38 = arith.constant dense<0.000000e+00> : vector<1x32xf32>
    %92 = vector.multi_reduction <add>, %69, %cst_38 [2] : vector<1x32x256xf32> to vector<1x32xf32>
    %93 = vector.shape_cast %92 : vector<1x32xf32> to vector<1x32x1xf32>
    %cst_39 = arith.constant 2.560000e+02 : f32
    %94 = vector.broadcast %cst_39 : f32 to vector<1x32x1xf32>
    %95 = arith.divf %93, %94 : vector<1x32x1xf32>
    %96 = vector.extract_strided_slice %8 {offsets = [1, 0, 0], sizes = [1, 8, 32], strides = [1, 1, 1]} : vector<3x8x32xbf16> to vector<1x8x32xbf16>
    %97 = vector.shape_cast %96 : vector<1x8x32xbf16> to vector<8x32xbf16>
    %98 = vector.shape_cast %97 : vector<8x32xbf16> to vector<1x8x32xbf16>
    %99 = arith.truncf %95 : vector<1x32x1xf32> to vector<1x32x1xbf16>
    %cst_40 = arith.constant dense<0.000000e+00> : vector<1x8x1xf32>
    %100 = tpu.matmul %98, %99, %cst_40 {dimension_numbers = #tpu.dot_dimension_numbers<[2], [1], [1], [2], [0, 0, 0, 1, 1, 2], [0], [0]>} : vector<1x8x32xbf16>, vector<1x32x1xbf16>, vector<1x8x1xf32> -> vector<1x8x1xf32>
    %101 = vector.extract_strided_slice %9 {offsets = [1, 0, 0], sizes = [1, 8, 1], strides = [1, 1, 1]} : vector<3x8x1xf32> to vector<1x8x1xf32>
    %102 = vector.shape_cast %101 : vector<1x8x1xf32> to vector<8x1xf32>
    %103 = vector.shape_cast %102 : vector<8x1xf32> to vector<1x8x1xf32>
    %104 = arith.addf %100, %103 : vector<1x8x1xf32>
    %cst_41 = arith.constant 0.000000e+00 : f32
    %105 = vector.broadcast %cst_41 : f32 to vector<1x8x1xf32>
    %106 = arith.maximumf %104, %105 : vector<1x8x1xf32>
    %107 = vector.extract_strided_slice %10 {offsets = [1, 0, 0], sizes = [1, 32, 8], strides = [1, 1, 1]} : vector<3x32x8xbf16> to vector<1x32x8xbf16>
    %108 = vector.shape_cast %107 : vector<1x32x8xbf16> to vector<32x8xbf16>
    %109 = vector.shape_cast %108 : vector<32x8xbf16> to vector<1x32x8xbf16>
    %110 = arith.truncf %106 : vector<1x8x1xf32> to vector<1x8x1xbf16>
    %cst_42 = arith.constant dense<0.000000e+00> : vector<1x32x1xf32>
    %111 = tpu.matmul %109, %110, %cst_42 {dimension_numbers = #tpu.dot_dimension_numbers<[2], [1], [1], [2], [0, 0, 0, 1, 1, 2], [0], [0]>} : vector<1x32x8xbf16>, vector<1x8x1xbf16>, vector<1x32x1xf32> -> vector<1x32x1xf32>
    %112 = vector.extract_strided_slice %11 {offsets = [1, 0, 0], sizes = [1, 32, 1], strides = [1, 1, 1]} : vector<3x32x1xf32> to vector<1x32x1xf32>
    %113 = vector.shape_cast %112 : vector<1x32x1xf32> to vector<32x1xf32>
    %114 = vector.shape_cast %113 : vector<32x1xf32> to vector<1x32x1xf32>
    %115 = arith.addf %111, %114 : vector<1x32x1xf32>
    %116 = vector.broadcast %115 : vector<1x32x1xf32> to vector<1x32x256xf32>
    %117 = arith.addf %91, %116 : vector<1x32x256xf32>
    %118 = arith.negf %117 : vector<1x32x256xf32>
    %119 = math.exp %118 : vector<1x32x256xf32>
    %cst_43 = arith.constant 1.000000e+00 : f32
    %120 = vector.broadcast %cst_43 : f32 to vector<1x32x256xf32>
    %121 = arith.addf %120, %119 : vector<1x32x256xf32>
    %122 = arith.divf %120, %121 : vector<1x32x256xf32>
    %123 = arith.mulf %68, %122 : vector<1x32x256xf32>
    %124 = arith.addf %67, %123 : vector<1x32x256xf32>
    %125 = vector.extract_strided_slice %8 {offsets = [2, 0, 0], sizes = [1, 8, 32], strides = [1, 1, 1]} : vector<3x8x32xbf16> to vector<1x8x32xbf16>
    %126 = vector.shape_cast %125 : vector<1x8x32xbf16> to vector<8x32xbf16>
    %127 = vector.shape_cast %126 : vector<8x32xbf16> to vector<1x8x32xbf16>
    %128 = arith.truncf %124 : vector<1x32x256xf32> to vector<1x32x256xbf16>
    %cst_44 = arith.constant dense<0.000000e+00> : vector<1x8x256xf32>
    %129 = tpu.matmul %127, %128, %cst_44 {dimension_numbers = #tpu.dot_dimension_numbers<[2], [1], [1], [2], [0, 0, 0, 1, 1, 2], [0], [0]>} : vector<1x8x32xbf16>, vector<1x32x256xbf16>, vector<1x8x256xf32> -> vector<1x8x256xf32>
    %130 = vector.extract_strided_slice %9 {offsets = [2, 0, 0], sizes = [1, 8, 1], strides = [1, 1, 1]} : vector<3x8x1xf32> to vector<1x8x1xf32>
    %131 = vector.shape_cast %130 : vector<1x8x1xf32> to vector<8x1xf32>
    %132 = vector.shape_cast %131 : vector<8x1xf32> to vector<1x8x1xf32>
    %133 = vector.broadcast %132 : vector<1x8x1xf32> to vector<1x8x256xf32>
    %134 = arith.addf %129, %133 : vector<1x8x256xf32>
    %cst_45 = arith.constant 0.000000e+00 : f32
    %135 = vector.broadcast %cst_45 : f32 to vector<1x8x256xf32>
    %136 = arith.maximumf %134, %135 : vector<1x8x256xf32>
    %137 = vector.extract_strided_slice %10 {offsets = [2, 0, 0], sizes = [1, 32, 8], strides = [1, 1, 1]} : vector<3x32x8xbf16> to vector<1x32x8xbf16>
    %138 = vector.shape_cast %137 : vector<1x32x8xbf16> to vector<32x8xbf16>
    %139 = vector.shape_cast %138 : vector<32x8xbf16> to vector<1x32x8xbf16>
    %140 = arith.truncf %136 : vector<1x8x256xf32> to vector<1x8x256xbf16>
    %cst_46 = arith.constant dense<0.000000e+00> : vector<1x32x256xf32>
    %141 = tpu.matmul %139, %140, %cst_46 {dimension_numbers = #tpu.dot_dimension_numbers<[2], [1], [1], [2], [0, 0, 0, 1, 1, 2], [0], [0]>} : vector<1x32x8xbf16>, vector<1x8x256xbf16>, vector<1x32x256xf32> -> vector<1x32x256xf32>
    %142 = vector.extract_strided_slice %11 {offsets = [2, 0, 0], sizes = [1, 32, 1], strides = [1, 1, 1]} : vector<3x32x1xf32> to vector<1x32x1xf32>
    %143 = vector.shape_cast %142 : vector<1x32x1xf32> to vector<32x1xf32>
    %144 = vector.shape_cast %143 : vector<32x1xf32> to vector<1x32x1xf32>
    %145 = vector.broadcast %144 : vector<1x32x1xf32> to vector<1x32x256xf32>
    %146 = arith.addf %141, %145 : vector<1x32x256xf32>
    %cst_47 = arith.constant dense<0.000000e+00> : vector<1x32xf32>
    %147 = vector.multi_reduction <add>, %124, %cst_47 [2] : vector<1x32x256xf32> to vector<1x32xf32>
    %148 = vector.shape_cast %147 : vector<1x32xf32> to vector<1x32x1xf32>
    %cst_48 = arith.constant 2.560000e+02 : f32
    %149 = vector.broadcast %cst_48 : f32 to vector<1x32x1xf32>
    %150 = arith.divf %148, %149 : vector<1x32x1xf32>
    %151 = vector.extract_strided_slice %8 {offsets = [1, 0, 0], sizes = [1, 8, 32], strides = [1, 1, 1]} : vector<3x8x32xbf16> to vector<1x8x32xbf16>
    %152 = vector.shape_cast %151 : vector<1x8x32xbf16> to vector<8x32xbf16>
    %153 = vector.shape_cast %152 : vector<8x32xbf16> to vector<1x8x32xbf16>
    %154 = arith.truncf %150 : vector<1x32x1xf32> to vector<1x32x1xbf16>
    %cst_49 = arith.constant dense<0.000000e+00> : vector<1x8x1xf32>
    %155 = tpu.matmul %153, %154, %cst_49 {dimension_numbers = #tpu.dot_dimension_numbers<[2], [1], [1], [2], [0, 0, 0, 1, 1, 2], [0], [0]>} : vector<1x8x32xbf16>, vector<1x32x1xbf16>, vector<1x8x1xf32> -> vector<1x8x1xf32>
    %156 = vector.extract_strided_slice %9 {offsets = [1, 0, 0], sizes = [1, 8, 1], strides = [1, 1, 1]} : vector<3x8x1xf32> to vector<1x8x1xf32>
    %157 = vector.shape_cast %156 : vector<1x8x1xf32> to vector<8x1xf32>
    %158 = vector.shape_cast %157 : vector<8x1xf32> to vector<1x8x1xf32>
    %159 = arith.addf %155, %158 : vector<1x8x1xf32>
    %cst_50 = arith.constant 0.000000e+00 : f32
    %160 = vector.broadcast %cst_50 : f32 to vector<1x8x1xf32>
    %161 = arith.maximumf %159, %160 : vector<1x8x1xf32>
    %162 = vector.extract_strided_slice %10 {offsets = [1, 0, 0], sizes = [1, 32, 8], strides = [1, 1, 1]} : vector<3x32x8xbf16> to vector<1x32x8xbf16>
    %163 = vector.shape_cast %162 : vector<1x32x8xbf16> to vector<32x8xbf16>
    %164 = vector.shape_cast %163 : vector<32x8xbf16> to vector<1x32x8xbf16>
    %165 = arith.truncf %161 : vector<1x8x1xf32> to vector<1x8x1xbf16>
    %cst_51 = arith.constant dense<0.000000e+00> : vector<1x32x1xf32>
    %166 = tpu.matmul %164, %165, %cst_51 {dimension_numbers = #tpu.dot_dimension_numbers<[2], [1], [1], [2], [0, 0, 0, 1, 1, 2], [0], [0]>} : vector<1x32x8xbf16>, vector<1x8x1xbf16>, vector<1x32x1xf32> -> vector<1x32x1xf32>
    %167 = vector.extract_strided_slice %11 {offsets = [1, 0, 0], sizes = [1, 32, 1], strides = [1, 1, 1]} : vector<3x32x1xf32> to vector<1x32x1xf32>
    %168 = vector.shape_cast %167 : vector<1x32x1xf32> to vector<32x1xf32>
    %169 = vector.shape_cast %168 : vector<32x1xf32> to vector<1x32x1xf32>
    %170 = arith.addf %166, %169 : vector<1x32x1xf32>
    %171 = vector.broadcast %170 : vector<1x32x1xf32> to vector<1x32x256xf32>
    %172 = arith.addf %146, %171 : vector<1x32x256xf32>
    %173 = arith.negf %172 : vector<1x32x256xf32>
    %174 = math.exp %173 : vector<1x32x256xf32>
    %cst_52 = arith.constant 1.000000e+00 : f32
    %175 = vector.broadcast %cst_52 : f32 to vector<1x32x256xf32>
    %176 = arith.addf %175, %174 : vector<1x32x256xf32>
    %177 = arith.divf %175, %176 : vector<1x32x256xf32>
    %178 = arith.mulf %68, %177 : vector<1x32x256xf32>
    %179 = arith.addf %67, %178 : vector<1x32x256xf32>
    %180 = arith.truncf %179 : vector<1x32x256xf32> to vector<1x32x256xbf16>
    %c0_53 = arith.constant 0 : index
    %c0_54 = arith.constant 0 : index
    %c0_55 = arith.constant 0 : index
    %181 = vector.load %arg8[%c0_53, %c0_54, %c0_55] : memref<1x32x256xbf16, #tpu.memory_space<vmem>>, vector<1x32x256xbf16>
    tpu.vector_store %arg8[%c0_53, %c0_54, %c0_55], %180 {strides = array<i32>} : memref<1x32x256xbf16, #tpu.memory_space<vmem>>, vector<1x32x256xbf16>,
    return
  }
  func.func @transform_0(%arg0: i32) -> (i32, i32, i32) {
    %c0_i32 = arith.constant 0 : i32
    %c0_i32_0 = arith.constant 0 : i32
    %c0_i32_1 = arith.constant 0 : i32
    return %arg0, %c0_i32, %c0_i32_0 : i32, i32, i32
  }
  func.func @transform_1(%arg0: i32) -> (i32, i32, i32) {
    %c0_i32 = arith.constant 0 : i32
    %c0_i32_0 = arith.constant 0 : i32
    %c0_i32_1 = arith.constant 0 : i32
    return %arg0, %c0_i32, %c0_i32_0 : i32, i32, i32
  }
  func.func @transform_2(%arg0: i32) -> (i32, i32, i32) {
    %c0_i32 = arith.constant 0 : i32
    %c0_i32_0 = arith.constant 0 : i32
    %c0_i32_1 = arith.constant 0 : i32
    %c0_i32_2 = arith.constant 0 : i32
    return %c0_i32, %c0_i32_0, %c0_i32_1 : i32, i32, i32
  }
  func.func @transform_3(%arg0: i32) -> (i32, i32, i32) {
    %c0_i32 = arith.constant 0 : i32
    %c0_i32_0 = arith.constant 0 : i32
    %c0_i32_1 = arith.constant 0 : i32
    %c0_i32_2 = arith.constant 0 : i32
    return %c0_i32, %c0_i32_0, %c0_i32_1 : i32, i32, i32
  }
  func.func @transform_4(%arg0: i32) -> (i32, i32, i32) {
    %c0_i32 = arith.constant 0 : i32
    %c0_i32_0 = arith.constant 0 : i32
    %c0_i32_1 = arith.constant 0 : i32
    %c0_i32_2 = arith.constant 0 : i32
    return %c0_i32, %c0_i32_0, %c0_i32_1 : i32, i32, i32
  }
  func.func @transform_5(%arg0: i32) -> (i32, i32, i32) {
    %c0_i32 = arith.constant 0 : i32
    %c0_i32_0 = arith.constant 0 : i32
    %c0_i32_1 = arith.constant 0 : i32
    %c0_i32_2 = arith.constant 0 : i32
    return %c0_i32, %c0_i32_0, %c0_i32_1 : i32, i32, i32
  }
  func.func @transform_6(%arg0: i32) -> (i32, i32, i32) {
    %c0_i32 = arith.constant 0 : i32
    %c0_i32_0 = arith.constant 0 : i32
    %c0_i32_1 = arith.constant 0 : i32
    %c0_i32_2 = arith.constant 0 : i32
    return %c0_i32, %c0_i32_0, %c0_i32_1 : i32, i32, i32
  }
  func.func @transform_7(%arg0: i32) -> (i32, i32, i32) {
    %c0_i32 = arith.constant 0 : i32
    %c0_i32_0 = arith.constant 0 : i32
    %c0_i32_1 = arith.constant 0 : i32
    return %arg0, %c0_i32, %c0_i32_0 : i32, i32, i32
  }
}

</mosaic_0001>

<bundles_post_ra>
// kernel: cross_co_attention.1
= control target key start
LH: loop header
LB: loop body
LE: loop exit
PB: predicated region body
PF: predicated region fallthrough
CT: control target
= control target key end

     0   :  { %s1882_s24 = smov 0   ;;  %s2606_s0 = inlined_call_operand.vmem [shape: bf16[4,32,256], index: 0, kind: input, shape index: {}]   ;;  %s2607_s1 = inlined_call_operand.vmem [shape: bf16[4,32,256], index: 1, kind: input, shape index: {}]   ;;  %s2608_s2 = inlined_call_operand.vmem [shape: f32[3,32,1], index: 2, kind: input, shape index: {}]   ;;  %s2609_s3 = inlined_call_operand.vmem [shape: bf16[3,8,32], index: 3, kind: input, shape index: {}]   ;;  %s2610_s4 = inlined_call_operand.vmem [shape: f32[3,8,1], index: 4, kind: input, shape index: {}]   ;;  %s2611_s5 = inlined_call_operand.vmem [shape: bf16[3,32,8], index: 5, kind: input, shape index: {}]   ;;  %s2612_s6 = inlined_call_operand.vmem [shape: f32[3,32,1], index: 6, kind: input, shape index: {}]   ;;  %s2613_s7 = inlined_call_operand.vmem [shape: bf16[4,32,256], index: 7, kind: output, shape index: {}]  }
   0x1 LB: > { %s1624_s25 = sadd.s32 4294967295, %s1837_s24   ;;  %p1628_p0 = scmp.ge.s32.totalorder %s1837_s24, 1  ;;  %s1837_s24 = sphi %s1882_s24, %s17_s24  }
   0x2   : > { %p247_p1 = scmp.lt.s32.totalorder %s1837_s24, 5 }
   0x4   : > { %p248_p2 = pnand %p1628_p0, %p247_p1 }
   0x5   : > { %p284_p3 = scmp.lt.s32.totalorder (!%p248_p2), %s1624_s25, 3 }
   0x6   : > { %251 = sbr.rel (%p248_p2) target bundleno = 1507 (0x5e3), region = 48 }
   0xb   : > { %s2627_s25 = smov (!%p284_p3, %s1624_s25), 3  ;;  %v1839_v54 = vmov 0   ;;  %vm448_vm12 = vcmask 7168  }
   0xc   : > { %s1890_s26 = sshll.u32 %s2627_s25, 5  ;;  %1726 = vset.pattern.permute.xlu1 %v1839_v54  ;;  %1725 = vset.pattern.permute.xlu0 %v1839_v54 }
   0xd   : > { %s1896_s29 = scalar_lea.vmem %s2607_s1, %s1890_s26  ;;  %s1903_s9 = scalar_lea.vmem %s2606_s0, %s1890_s26  ;;  %1724 = vset.pattern.permute.xlu2 %v1839_v54 }
   0xe   : > { %v304_v0 = vld [vmem:[%s1896_s29] sm:$0xff]  ;;  %v305_v1 = vld [vmem:[%s1896_s29 + $0x8] sm:$0xff]  ;;  %v302_v4 = vld [vmem:[%s1903_s9 + $0x10] sm:$0xff]  ;;  %s2555_s21 = scalar_lea.vmem %s2613_s7, %s1890_s26 }
   0xf   : > { %v1906_v2 = vunpack.c.l.bf16 %v304_v0  ;;  %v1908_v3 = vunpack.c.h.bf16 %v304_v0  ;;  %v300_v5 = vld [vmem:[%s1903_s9] sm:$0xff]  ;;  %v1912_v6 = vunpack.c.l.bf16 %v302_v4  ;;  %v1914_v7 = vunpack.c.h.bf16 %v302_v4  ;;  %v306_v10 = vld [vmem:[%s1896_s29 + $0x10] sm:$0xff]  ;;  %v301_v15 = vld [vmem:[%s1903_s9 + $0x8] sm:$0xff] }
  0x10   : > { %v1916_v8 = vunpack.c.l.bf16 %v300_v5  ;;  %v1918_v9 = vunpack.c.h.bf16 %v300_v5  ;;  %v1925_v13 = vunpack.c.l.bf16 %v305_v1  ;;  %v1927_v14 = vunpack.c.h.bf16 %v305_v1  ;;  %v307_v33 = vld [vmem:[%s1896_s29 + $0x18] sm:$0xff] }
  0x11   : > { %v529_v11 = vmul.f32 %v1906_v2, %v1906_v2  ;;  %v530_v12 = vmul.f32 %v1908_v3, %v1908_v3  ;;  %v372_v16 = vmul.f32 %v1912_v6, %v1912_v6  ;;  %v373_v17 = vmul.f32 %v1914_v7, %v1914_v7  ;;  %v303_v34 = vld [vmem:[%s1903_s9 + $0x18] sm:$0xff] }
  0x12   : > { %v368_v18 = vmul.f32 %v1916_v8, %v1916_v8  ;;  %v369_v19 = vmul.f32 %v1918_v9, %v1918_v9  ;;  %v1938_v21 = vunpack.c.l.bf16 %v306_v10  ;;  %v1940_v22 = vunpack.c.h.bf16 %v306_v10 }
  0x13   : > { %v537_v20 = vadd.f32 %v530_v12, %v529_v11  ;;  %v382_v23 = vadd.f32 %v373_v17, %v372_v16  ;;  %v1942_v25 = vunpack.c.l.bf16 %v301_v15  ;;  %v1944_v26 = vunpack.c.h.bf16 %v301_v15 }
  0x14   : > { %v376_v24 = vadd.f32 %v369_v19, %v368_v18  ;;  %v531_v27 = vmul.f32 %v1925_v13, %v1925_v13  ;;  %v532_v28 = vmul.f32 %v1927_v14, %v1927_v14  ;;  %v533_v29 = vmul.f32 %v1938_v21, %v1938_v21 }
  0x15   : > { %538 = vadd.xlane.f32.xlu1 %v537_v20  ;;  %383 = vadd.xlane.f32.xlu2 %v382_v23  ;;  %v534_v30 = vmul.f32 %v1940_v22, %v1940_v22  ;;  %v370_v31 = vmul.f32 %v1942_v25, %v1942_v25  ;;  %v371_v32 = vmul.f32 %v1944_v26, %v1944_v26  ;;  %v1960_v36 = vunpack.c.l.bf16 %v307_v33 }
  0x16   : > { %377 = vadd.xlane.f32.xlu0 %v376_v24  ;;  %v540_v35 = vadd.f32 %v532_v28, %v531_v27  ;;  %v1962_v37 = vunpack.c.h.bf16 %v307_v33  ;;  %v1964_v40 = vunpack.c.l.bf16 %v303_v34  ;;  %v1966_v41 = vunpack.c.h.bf16 %v303_v34 }
  0x17   : > { %v543_v38 = vadd.f32 %v534_v30, %v533_v29  ;;  %v379_v39 = vadd.f32 %v371_v32, %v370_v31  ;;  %v535_v42 = vmul.f32 %v1960_v36, %v1960_v36  ;;  %v1840_v24 = vmov 32.0  }
  0x18   : > { %v536_v43 = vmul.f32 %v1962_v37, %v1962_v37  ;;  %v374_v44 = vmul.f32 %v1964_v40, %v1964_v40  ;;  %v375_v45 = vmul.f32 %v1966_v41, %v1966_v41 }
  0x1a   : > { %v546_v46 = vadd.f32 %v536_v43, %v535_v42  ;;  %v385_v47 = vadd.f32 %v375_v45, %v374_v44 }
  0x1d   : > { %541 = vadd.xlane.f32.xlu1 %v540_v35  ;;  %544 = vadd.xlane.f32.xlu2 %v543_v38 }
  0x1e   : > { %380 = vadd.xlane.f32.xlu0 %v379_v39 }
  0x25   : > { %547 = vadd.xlane.f32.xlu1 %v546_v46 }
  0x26   : > { %386 = vadd.xlane.f32.xlu0 %v385_v47 }
  0x88   : > { %v539_v48 = vpop.xlane.xlu1 %538  ;;  %v384_v50 = vpop.xlane.xlu2 %383 }
  0x89   : > { %v1976_v49 = vadd.f32 1e-05, %v539_v48  ;;  %v378_v51 = vpop.xlane.xlu0 %377  ;;  %v1978_v52 = vadd.f32 1e-05, %v384_v50 }
  0x8a   : > { %v1980_v53 = vadd.f32 1e-05, %v378_v51 }
  0x8b   : > { %1727 = vrsqrt.f32 %v1976_v49  ;;  %vm560_vm0 = vcmp.eq.f32.partialorder %v1976_v49, inf  ;;  %vm562_vm1 = vcmp.eq.f32.partialorder %v1976_v49, 0.0  ;;  %v563_v33 = vand.u32 2147483648, %v1976_v49 }
  0x8c   : > { %1729 = vrsqrt.f32 %v1978_v52  ;;  %vm399_vm2 = vcmp.eq.f32.partialorder %v1980_v53, inf  ;;  %v402_v34 = vand.u32 2147483648, %v1980_v53  ;;  %vm423_vm3 = vcmp.eq.f32.partialorder %v1978_v52, inf }
  0x8d   : > { %1731 = vrsqrt.f32 %v1980_v53  ;;  %vm401_vm4 = vcmp.eq.f32.partialorder %v1980_v53, 0.0  ;;  %v426_v44 = vand.u32 2147483648, %v1978_v52  ;;  %vm425_vm7 = vcmp.eq.f32.partialorder %v1978_v52, 0.0 }
  0x90   : > { %v542_v55 = vpop.xlane.xlu1 %541  ;;  %v545_v58 = vpop.xlane.xlu2 %544 }
  0x91   : > { %v1728_v56 = vpop.eup %1727  ;;  %v1985_v57 = vadd.f32 1e-05, %v542_v55  ;;  %v381_v59 = vpop.xlane.xlu0 %380  ;;  %v1988_v62 = vadd.f32 1e-05, %v545_v58 }
  0x92   : > { %v1730_v60 = vpop.eup %1729  ;;  %v554_v61 = vmul.f32 %v1728_v56, %v1976_v49  ;;  %v1990_v63 = vadd.f32 1e-05, %v381_v59 }
  0x93   : > { %v1732_v0 = vpop.eup %1731  ;;  %v417_v1 = vmul.f32 %v1730_v60, %v1978_v52  ;;  %1733 = vrsqrt.f32 %v1985_v57  ;;  %vm572_vm5 = vcmp.eq.f32.partialorder %v1985_v57, inf  ;;  %vm574_vm6 = vcmp.eq.f32.partialorder %v1985_v57, 0.0 }
  0x94   : > { %v555_v4 = vmul.f32 %v1728_v56, %v554_v61  ;;  %v393_v5 = vmul.f32 %v1732_v0, %v1980_v53  ;;  %1735 = vrsqrt.f32 %v1988_v62  ;;  %v575_v58 = vand.u32 2147483648, %v1985_v57  ;;  %v308_v61 = vld [vmem:[%s2608_s2] sm:$0xff] }
  0x95   : > { %1737 = vrsqrt.f32 %v1990_v63  ;;  %v418_v12 = vmul.f32 %v1730_v60, %v417_v1  ;;  %vm411_vm8 = vcmp.eq.f32.partialorder %v1990_v63, inf  ;;  %vm413_vm9 = vcmp.eq.f32.partialorder %v1990_v63, 0.0 }
  0x96   : > { %v556_v10 = vmul.f32 0.5, %v555_v4  ;;  %v394_v11 = vmul.f32 %v1732_v0, %v393_v5  ;;  %1739 = vrcp.f32 %v1840_v24  ;;  %vm584_vm10 = vcmp.eq.f32.partialorder %v1988_v62, inf }
  0x97   : > { %v419_v23 = vmul.f32 0.5, %v418_v12  ;;  %vm586_vm11 = vcmp.eq.f32.partialorder %v1988_v62, 0.0 }
  0x98   : > { %v557_v15 = vsub.f32 1.5, %v556_v10  ;;  %v395_v16 = vmul.f32 0.5, %v394_v11  ;;  %v548_v17 = vpop.xlane.xlu1 %547  ;;  %v414_v11 = vand.u32 2147483648, %v1990_v63 }
  0x99   : > { %v1734_v18 = vpop.eup %1733  ;;  %v1999_v19 = vadd.f32 1e-05, %v548_v17  ;;  %v387_v20 = vpop.xlane.xlu0 %386  ;;  %v420_v43 = vsub.f32 1.5, %v419_v23 }
  0x9a   : > { %v1736_v27 = vpop.eup %1735  ;;  %v558_v28 = vmul.f32 %v1728_v56, %v557_v15  ;;  %v396_v29 = vsub.f32 1.5, %v395_v16  ;;  %v566_v30 = vmul.f32 %v1734_v18, %v1985_v57  ;;  %v2002_v31 = vadd.f32 1e-05, %v387_v20 }
  0x9b   : > { %v1738_v32 = vpop.eup %1737  ;;  %1741 = vrsqrt.f32 %v1999_v19  ;;  %v578_v45 = vmul.f32 %v1736_v27, %v1988_v62  ;;  %v421_v54 = vmul.f32 %v1730_v60, %v420_v43  ;;  %vm596_vm13 = vcmp.eq.f32.partialorder %v1999_v19, inf }
  0x9c   : > { %v559_v35 = vmul.f32 %v558_v28, %v1976_v49  ;;  %v397_v38 = vmul.f32 %v1732_v0, %v396_v29  ;;  %v567_v39 = vmul.f32 %v1734_v18, %v566_v30  ;;  %v405_v42 = vmul.f32 %v1738_v32, %v1990_v63  ;;  %v2019_v50 = vpop.eup %1739 }
  0x9d   : > { %1743 = vrsqrt.f32 %v2002_v31  ;;  %v579_v55 = vmul.f32 %v1736_v27, %v578_v45  ;;  %v422_v60 = vmul.f32 %v421_v54, %v1978_v52  ;;  %v587_v30 = vand.u32 2147483648, %v1988_v62 }
  0x9e   : > { %v561_v46 = vsel %vm560_vm0, %v1976_v49, %v559_v35  ;;  %v568_v47 = vmul.f32 0.5, %v567_v39  ;;  %v406_v48 = vmul.f32 %v1738_v32, %v405_v42  ;;  %v398_v51 = vmul.f32 %v397_v38, %v1980_v53 }
  0x9f   : > { %v564_v0 = vsel %vm562_vm1, %v563_v33, %v561_v46  ;;  %v580_v4 = vmul.f32 0.5, %v579_v55  ;;  %v424_v28 = vsel %vm423_vm3, %v1978_v52, %v422_v60  ;;  %v311_v60 = vld [vmem:[%s2608_s2 + $0x18] sm:$0xff]  ;;  %vm598_vm14 = vcmp.eq.f32.partialorder %v1999_v19, 0.0 }
  0xa0   : > { %v569_v56 = vsub.f32 1.5, %v568_v47  ;;  %v407_v59 = vmul.f32 0.5, %v406_v48  ;;  %v400_v49 = vsel %vm399_vm2, %v1980_v53, %v398_v51  ;;  %v2039_v17 = vmul.f32 %v564_v0, %v308_v61 }
  0xa1   : > { %v1742_v1 = vpop.eup %1741  ;;  %v581_v16 = vsub.f32 1.5, %v580_v4  ;;  %v403_v39 = vsel %vm401_vm4, %v402_v34, %v400_v49  ;;  %v427_v48 = vsel %vm425_vm7, %v426_v44, %v424_v28  ;;  %vm435_vm15 = vcmp.eq.f32.partialorder %v2002_v31, inf }
  0xa2   : > { %v570_v5 = vmul.f32 %v1734_v18, %v569_v56  ;;  %v408_v10 = vsub.f32 1.5, %v407_v59  ;;  %v590_v12 = vmul.f32 %v1742_v1, %v1999_v19  ;;  %v309_v18 = vld [vmem:[%s2608_s2 + $0x8] sm:$0xff]  ;;  %v2074_v54 = vmul.f32 %v403_v39, %v308_v61  ;;  %v310_v56 = vld [vmem:[%s2608_s2 + $0x10] sm:$0xff] }
  0xa3   : > { %v1744_v15 = vpop.eup %1743  ;;  %v582_v29 = vmul.f32 %v1736_v27, %v581_v16  ;;  %v605_v27 = vmul.f32 %v2039_v17, %v2039_v17  ;;  %v2096_v4 = vmul.f32 %v427_v48, %v310_v56  ;;  %v438_v28 = vand.u32 2147483648, %v2002_v31 }
  0xa4   : > { %v571_v20 = vmul.f32 %v570_v5, %v1985_v57  ;;  %v409_v23 = vmul.f32 %v1738_v32, %v408_v10  ;;  %v591_v24 = vmul.f32 %v1742_v1, %v590_v12  ;;  %v429_v33 = vmul.f32 %v1744_v15, %v2002_v31 }
  0xa5   : > { %v583_v43 = vmul.f32 %v582_v29, %v1988_v62  ;;  %v444_v10 = vmul.f32 %v2074_v54, %v2074_v54  ;;  %v609_v49 = vsel %vm448_vm12, %v605_v27, 0.0  ;;  %vm437_vm0 = vcmp.eq.f32.partialorder %v2002_v31, 0.0 }
  0xa6   : > { %v573_v32 = vsel %vm572_vm5, %v1985_v57, %v571_v20  ;;  %v410_v35 = vmul.f32 %v409_v23, %v1990_v63  ;;  %v592_v38 = vmul.f32 0.5, %v591_v24  ;;  %v430_v45 = vmul.f32 %v1744_v15, %v429_v33 }
  0xa7   : > { %v576_v42 = vsel %vm574_vm6, %v575_v58, %v573_v32  ;;  %v585_v53 = vsel %vm584_vm10, %v1988_v62, %v583_v43  ;;  %v599_v62 = vand.u32 2147483648, %v1999_v19  ;;  %vm467_vm1 = vweird.f32 %v2019_v50 }
  0xa8   : > { %v412_v46 = vsel %vm411_vm8, %v1990_v63, %v410_v35  ;;  %v593_v47 = vsub.f32 1.5, %v592_v38  ;;  %v2067_v51 = vmul.f32 %v576_v42, %v309_v18  ;;  %v431_v34 = vmul.f32 0.5, %v430_v45 }
  0xa9   : > { %v415_v57 = vsel %vm413_vm9, %v414_v11, %v412_v46  ;;  %v588_v52 = vsel %vm586_vm11, %v587_v30, %v585_v53  ;;  %v449_v30 = vsel %vm448_vm12, %v444_v10, 0.0  ;;  %vm727_vm8 = vcmask 261120  }
  0xaa   : > { %v594_v55 = vmul.f32 %v1742_v1, %v593_v47  ;;  %v606_v44 = vmul.f32 %v2067_v51, %v2067_v51  ;;  %v2083_v58 = vmul.f32 %v415_v57, %v309_v18  ;;  %v2085_v59 = vmul.f32 %v588_v52, %v310_v56 }
  0xab   : > { %v432_v63 = vsub.f32 1.5, %v431_v34  ;;  %vm802_vm10 = vcmask 1043456   ;;  %vm795_vm11 = vcmask 64512  }
  0xac   : > { %v595_v61 = vmul.f32 %v594_v55, %v1999_v19  ;;  %v610_v0 = vsel %vm448_vm12, %v606_v44, 0.0  ;;  %v445_v1 = vmul.f32 %v2083_v58, %v2083_v58  ;;  %v607_v12 = vmul.f32 %v2085_v59, %v2085_v59 }
  0xad   : > { %v433_v5 = vmul.f32 %v1744_v15, %v432_v63  ;;  %v611_v20 = vadd.f32 %v610_v0, %v609_v49  ;;  %v463_v15 = vmul.f32 32.0, %v2019_v50 }
  0xae   : > { %v597_v11 = vsel %vm596_vm13, %v1999_v19, %v595_v61  ;;  %v450_v24 = vsel %vm448_vm12, %v445_v1, 0.0  ;;  %v446_v19 = vmul.f32 %v2096_v4, %v2096_v4  ;;  %v612_v32 = vsel %vm448_vm12, %v607_v12, 0.0 }
  0xaf   : > { %v600_v16 = vsel %vm598_vm14, %v599_v62, %v597_v11  ;;  %v434_v23 = vmul.f32 %v433_v5, %v2002_v31  ;;  %v451_v38 = vadd.f32 %v450_v24, %v449_v30  ;;  %v613_v39 = vadd.f32 %v612_v32, %v611_v20  ;;  %v1637_v32 = vld [vmem:[%s2608_s2 + $0x30] sm:$0xff] }
  0xb0   : > { %v2108_v18 = vmul.f32 %v600_v16, %v311_v60  ;;  %v464_v43 = vsub.f32 1.0, %v463_v15  ;;  %v452_v45 = vsel %vm448_vm12, %v446_v19, 0.0 }
  0xb1   : > { %v436_v29 = vsel %vm435_vm15, %v2002_v31, %v434_v23  ;;  %v453_v47 = vadd.f32 %v452_v45, %v451_v38 }
  0xb2   : > { %v608_v33 = vmul.f32 %v2108_v18, %v2108_v18  ;;  %v439_v35 = vsel %vm437_vm0, %v438_v28, %v436_v29  ;;  %v465_v57 = vmul.f32 %v2019_v50, %v464_v43 }
  0xb3   : > { %v2120_v42 = vmul.f32 %v439_v35, %v311_v60 }
  0xb4   : > { %v614_v27 = vsel %vm448_vm12, %v608_v33, 0.0  ;;  %v466_v44 = vadd.f32 %v2019_v50, %v465_v57 }
  0xb5   : > { %v615_v46 = vadd.f32 %v614_v27, %v613_v39  ;;  %v447_v31 = vmul.f32 %v2120_v42, %v2120_v42  ;;  %v1638_v27 = vld [vmem:[%s2608_s2 + $0x38] sm:$0xff] }
  0xb6   : > { %v468_v62 = vsel %vm467_vm1, %v2019_v50, %v466_v44 }
  0xb7   : > { %v616_v48 = vrot.slane %v615_v46, 4  ;;  %v454_v53 = vsel %vm448_vm12, %v447_v31, 0.0  ;;  %v1641_v31 = vld [vmem:[%s2608_s2 + $0x50] sm:$0xff] }
  0xb8   : > { %v455_v34 = vadd.f32 %v454_v53, %v453_v47 }
  0xb9   : > { %v617_v55 = vadd.f32 %v616_v48, %v615_v46  ;;  %v1636_v46 = vld [vmem:[%s2608_s2 + $0x28] sm:$0xff] }
  0xba   : > { %v456_v56 = vrot.slane %v455_v34, 4 }
  0xbb   : > { %v618_v52 = vrot.slane %v617_v55, 2 }
  0xbc   : > { %v457_v63 = vadd.f32 %v456_v56, %v455_v34  ;;  %v1642_v56 = vld [vmem:[%s2608_s2 + $0x58] sm:$0xff] }
  0xbd   : > { %v619_v61 = vadd.f32 %v618_v52, %v617_v55 }
  0xbe   : > { %v458_v0 = vrot.slane %v457_v63, 2 }
  0xbf   : > { %v620_v1 = vrot.slane %v619_v61, 1 }
  0xc0   : > { %v459_v60 = vadd.f32 %v458_v0, %v457_v63 }
  0xc1   : > { %v621_v5 = vadd.f32 %v620_v1, %v619_v61  ;;  %v1640_v61 = vld [vmem:[%s2608_s2 + $0x48] sm:$0xff] }
  0xc2   : > { %v460_v10 = vrot.slane %v459_v60, 1 }
  0xc3   : > { %v622_v11 = vmul.f32 %v621_v5, %v468_v62 }
  0xc4   : > { %v461_v12 = vadd.f32 %v460_v10, %v459_v60 }
  0xc5   : > { %v623_v49 = vadd.f32 1e-05, %v622_v11 }
  0xc6   : > { %v469_v16 = vmul.f32 %v468_v62, %v461_v12 }
  0xc7   : > { %1745 = vrsqrt.f32 %v623_v49  ;;  %vm630_vm3 = vweird.f32 %v623_v49 }
  0xc8   : > { %v470_v20 = vadd.f32 1e-05, %v469_v16 }
  0xca   : > { %1747 = vrsqrt.f32 %v470_v20  ;;  %vm477_vm6 = vweird.f32 %v470_v20 }
  0xcd   : > { %v1746_v23 = vpop.eup %1745 }
  0xce   : > { %v625_v24 = vmul.f32 %v1746_v23, %v623_v49  ;;  %vm631_vm2 = vweird.f32 %v1746_v23 }
  0xcf   : > { %vm632_vm4 = vmor %vm630_vm3, %vm631_vm2 }
  0xd0   : > { %v1748_v15 = vpop.eup %1747  ;;  %v626_v28 = vmul.f32 %v1746_v23, %v625_v24 }
  0xd1   : > { %v472_v19 = vmul.f32 %v1748_v15, %v470_v20  ;;  %vm478_vm5 = vweird.f32 %v1748_v15 }
  0xd2   : > { %v627_v29 = vmul.f32 0.5, %v626_v28  ;;  %vm479_vm7 = vmor %vm477_vm6, %vm478_vm5 }
  0xd3   : > { %v473_v30 = vmul.f32 %v1748_v15, %v472_v19 }
  0xd4   : > { %v628_v33 = vsub.f32 1.5, %v627_v29 }
  0xd5   : > { %v474_v50 = vmul.f32 0.5, %v473_v30 }
  0xd6   : > { %v629_v35 = vmul.f32 %v1746_v23, %v628_v33 }
  0xd7   : > { %v475_v38 = vsub.f32 1.5, %v474_v50 }
  0xd8   : > { %v633_v39 = vsel %vm632_vm4, %v1746_v23, %v629_v35 }
  0xd9   : > { %v636_v43 = vmul.f32 %v1637_v32, %v633_v39  ;;  %v476_v45 = vmul.f32 %v1748_v15, %v475_v38  ;;  %v637_v52 = vmul.f32 %v1638_v27, %v633_v39  ;;  %v635_v5 = vmul.f32 %v1636_v46, %v633_v39 }
  0xdb   : > { %v640_v47 = vmul.f32 %v636_v43, %v2085_v59  ;;  %v480_v48 = vsel %vm479_vm7, %v1748_v15, %v476_v45  ;;  %v641_v62 = vmul.f32 %v637_v52, %v2108_v18  ;;  %v639_v11 = vmul.f32 %v635_v5, %v2067_v51  ;;  %v1639_v15 = vld [vmem:[%s2608_s2 + $0x40] sm:$0xff] }
  0xdc   : > { %v484_v53 = vmul.f32 %v1638_v27, %v480_v48  ;;  %v483_v57 = vmul.f32 %v1637_v32, %v480_v48  ;;  %v482_v34 = vmul.f32 %v1636_v46, %v480_v48 }
  0xdd   : > { %v644_v55 = vadd.f32 %v1641_v31, %v640_v47  ;;  %v645_v10 = vadd.f32 %v1642_v56, %v641_v62  ;;  %v643_v18 = vadd.f32 %v1640_v61, %v639_v11 }
  0xde   : > { %v488_v44 = vmul.f32 %v484_v53, %v2120_v42  ;;  %v487_v63 = vmul.f32 %v483_v57, %v2096_v4  ;;  %v486_v59 = vmul.f32 %v482_v34, %v2083_v58  ;;  %v1635_v42 = vld [vmem:[%s2608_s2 + $0x20] sm:$0xff] }
  0xdf   : > { %1749 = vtanh.f32 %v644_v55  ;;  %v481_v12 = vmul.f32 %v1635_v42, %v480_v48  ;;  %v634_v19 = vmul.f32 %v1635_v42, %v633_v39 }
  0xe0   : > { %v492_v0 = vadd.f32 %v1642_v56, %v488_v44  ;;  %v491_v1 = vadd.f32 %v1641_v31, %v487_v63  ;;  %v490_v60 = vadd.f32 %v1640_v61, %v486_v59 }
  0xe1   : > { %v485_v23 = vmul.f32 %v481_v12, %v2074_v54  ;;  %v638_v33 = vmul.f32 %v634_v19, %v2039_v17 }
  0xe2   : > { %1751 = vtanh.f32 %v492_v0 }
  0xe3   : > { %1753 = vtanh.f32 %v491_v1  ;;  %v489_v51 = vadd.f32 %v1639_v15, %v485_v23  ;;  %v642_v54 = vadd.f32 %v1639_v15, %v638_v33  ;;  %v342_v33 = vld [vmem:[%s2612_s6 + $0x10] sm:$0xff] }
  0xe4   : > { %1755 = vtanh.f32 %v490_v60 }
  0xe5   : > { %v1750_v4 = vpop.eup %1749  ;;  %1757 = vtanh.f32 %v645_v10 }
  0xe6   : > { %v652_v58 = vadd.f32 1.0, %v1750_v4  ;;  %1759 = vtanh.f32 %v643_v18 }
  0xe7   : > { %1761 = vtanh.f32 %v489_v51 }
  0xe8   : > { %v1752_v49 = vpop.eup %1751  ;;  %666 = vperm.xlu1 %1726, %v652_v58   ;;  %1763 = vtanh.f32 %v642_v54  ;;  %v1841_v54 = vmov 256.0  }
  0xe9   : > { %v1754_v16 = vpop.eup %1753  ;;  %v500_v20 = vadd.f32 1.0, %v1752_v49  ;;  %1765 = vrcp.f32 %v1841_v54 }
  0xea   : > { %v499_v24 = vadd.f32 1.0, %v1754_v16  ;;  %v1756_v28 = vpop.eup %1755 }
  0xeb   : > { %518 = vperm.xlu0 %1725, %v500_v20   ;;  %v498_v29 = vadd.f32 1.0, %v1756_v28  ;;  %v1758_v30 = vpop.eup %1757 }
  0xec   : > { %513 = vperm.xlu2 %1724, %v499_v24   ;;  %v653_v50 = vadd.f32 1.0, %v1758_v30  ;;  %v1760_v32 = vpop.eup %1759  ;;  %v340_v30 = vld [vmem:[%s2612_s6] sm:$0xff] }
  0xed   : > { %v651_v35 = vadd.f32 1.0, %v1760_v32  ;;  %v1762_v38 = vpop.eup %1761  ;;  %v341_v32 = vld [vmem:[%s2612_s6 + $0x8] sm:$0xff] }
  0xee   : > { %v497_v43 = vadd.f32 1.0, %v1762_v38  ;;  %v1764_v27 = vpop.eup %1763 }
  0xef   : > { %v650_v45 = vadd.f32 1.0, %v1764_v27 }
  0xf0   : > { %508 = vperm.xlu1 %1726, %v498_v29   ;;  %v322_v29 = vld [vmem:[%s2609_s3] sm:$0xf] }
  0xf4   : > { %671 = vperm.xlu2 %1724, %v653_v50   ;;  %v343_v50 = vld [vmem:[%s2612_s6 + $0x18] sm:$0xff] }
  0xf8   : > { %661 = vperm.xlu1 %1726, %v651_v35   ;;  %v1766_v35 = vpop.eup %1765 }
  0xf9   : > { %v860_v38 = vmul.f32 256.0, %v1766_v35  ;;  %vm864_vm9 = vweird.f32 %v1766_v35 }
  0xfc   : > { %503 = vperm.xlu2 %1724, %v497_v43   ;;  %v861_v43 = vsub.f32 1.0, %v860_v38  ;;  %v2282_v38 = vld [vmem:[%s2611_s5 + $0x18] sm:$0xff] }
  0xfe   : > { %v862_v27 = vmul.f32 %v1766_v35, %v861_v43  ;;  %v2287_v43 = vld [vmem:[%s2611_s5 + $0x10] sm:$0xff] }
 0x104   : > { %656 = vperm.xlu2 %1724, %v650_v45   ;;  %v863_v45 = vadd.f32 %v1766_v35, %v862_v27 }
 0x146   : > { %v514_v39 = vpop.permute.xlu2 %513 }
 0x147   : > { %v2164_v48 = vmul.f32 %v514_v39, %v1912_v6  ;;  %v2167_v17 = vmul.f32 %v514_v39, %v1914_v7  ;;  %v2247_v39 = vsel %vm864_vm9, %v1766_v35, %v863_v45 }
 0x14e   : > { %v672_v46 = vpop.permute.xlu2 %671 }
 0x14f   : > { %v2176_v34 = vmul.f32 %v672_v46, %v1960_v36  ;;  %v2179_v55 = vmul.f32 %v672_v46, %v1962_v37 }
 0x156   : > { %v504_v31 = vpop.permute.xlu2 %503 }
 0x157   : > { %v2186_v52 = vmul.f32 %v504_v31, %v1916_v8 }
 0x15a   : > { %v667_v47 = vpop.permute.xlu1 %666 }
 0x15b   : > { %v2170_v53 = vmul.f32 %v667_v47, %v1938_v21  ;;  %v2173_v57 = vmul.f32 %v667_v47, %v1940_v22  ;;  %v2189_v21 = vmul.f32 %v504_v31, %v1918_v9 }
 0x15d   : > { %v519_v56 = vpop.permute.xlu0 %518  ;;  %v694_v6 = vadd.f32 %v2170_v53, %v2164_v48  ;;  %v695_v7 = vadd.f32 %v2173_v57, %v2167_v17 }
 0x15e   : > { %v2192_v22 = vmul.f32 %v519_v56, %v1964_v40  ;;  %v2195_v36 = vmul.f32 %v519_v56, %v1966_v41  ;;  %v657_v37 = vpop.permute.xlu2 %656 }
 0x15f   : > { %v2198_v44 = vmul.f32 %v657_v37, %v1906_v2  ;;  %v2201_v63 = vmul.f32 %v657_v37, %v1908_v3  ;;  %v853_v61 = vadd.f32 %v695_v7, %v694_v6  ;;  %v700_v59 = vpack.c.bf16 %v695_v7, %v694_v6 }
 0x160   : > { %v696_v8 = vadd.f32 %v2176_v34, %v2192_v22  ;;  %v697_v9 = vadd.f32 %v2179_v55, %v2195_v36 }
 0x161   : > { %854 = vadd.xlane.f32.xlu0 %v853_v61  ;;  %v690_v40 = vadd.f32 %v2198_v44, %v2186_v52  ;;  %v691_v41 = vadd.f32 %v2201_v63, %v2189_v21  ;;  %v715_v3 = vunpack.c.l.b16 %v700_v59  ;;  %v716_v62 = vunpack.c.h.b16 %v700_v59 }
 0x162   : > { %v856_v2 = vadd.f32 %v697_v9, %v696_v8  ;;  %v509_v0 = vpop.permute.xlu1 %508  ;;  %v701_v1 = vpack.c.bf16 %v697_v9, %v696_v8 }
 0x163   : > { %v847_v60 = vadd.f32 %v691_v41, %v690_v40  ;;  %v2212_v12 = vmul.f32 %v509_v0, %v1942_v25  ;;  %v2215_v58 = vmul.f32 %v509_v0, %v1944_v26  ;;  %v698_v23 = vpack.c.bf16 %v691_v41, %v690_v40 }
 0x164   : > { %857 = vadd.xlane.f32.xlu2 %v856_v2  ;;  %v717_v5 = vunpack.c.l.b16 %v701_v1  ;;  %v718_v42 = vunpack.c.h.b16 %v701_v1 }
 0x165   : > { %848 = vadd.xlane.f32.xlu1 %v847_v60  ;;  %v711_v25 = vunpack.c.l.b16 %v698_v23  ;;  %v712_v26 = vunpack.c.h.b16 %v698_v23  ;;  %v2256_v60 = vld [vmem:[%s2609_s3 + $0x4] sm:$0xf] }
 0x166   : > { %v721_v4 = vpack.c.b16 %v717_v5, %v715_v3  ;;  %v722_v10 = vpack.c.b16 %v718_v42, %v716_v62 }
 0x168   : > { %737 = vmatpush.bf16.msra.mxu0 %v721_v4  ;;  %750 = vmatpush.bf16.msra.mxu1 %v722_v10 }
 0x16a   : > { %v662_v11 = vpop.permute.xlu1 %661 }
 0x16b   : > { %v2218_v49 = vmul.f32 %v662_v11, %v1925_v13  ;;  %v2221_v16 = vmul.f32 %v662_v11, %v1927_v14  ;;  %v325_v13 = vld [vmem:[%s2610_s4] sm:$0xff] }
 0x16d   : > { %v692_v20 = vadd.f32 %v2218_v49, %v2212_v12  ;;  %v693_v18 = vadd.f32 %v2221_v16, %v2215_v58 }
 0x16f   : > { %v850_v24 = vadd.f32 %v693_v18, %v692_v20  ;;  %v699_v15 = vpack.c.bf16 %v693_v18, %v692_v20 }
 0x171   : > { %851 = vadd.xlane.f32.xlu2 %v850_v24  ;;  %v713_v28 = vunpack.c.l.b16 %v699_v15  ;;  %v714_v51 = vunpack.c.h.b16 %v699_v15 }
 0x173   : > { %v719_v14 = vpack.c.b16 %v713_v28, %v711_v25  ;;  %v720_v19 = vpack.c.b16 %v714_v51, %v712_v26 }
 0x175   : > { %704 = vperm.xlu0 %1725, %v325_v13   ;;  %738 = vmatpush.bf16.msra.mxu0 %v719_v14 }
 0x176   : > { %751 = vmatpush.bf16.msra.mxu1 %v720_v19  ;;  %v1706_v19 = vld [vmem:[%s2611_s5] sm:$0xff] }
 0x178   : > { %1643 = vmatmul.msk.bf16.vlgmr.msra.gmra.mxu0 %vm727_vm8, %v322_v29 }
 0x179   : > { %1644 = vmatmul.msk.bf16.vlgmr.msra.gmra.mxu1 %vm727_vm8, %v322_v29  ;;  %v1707_v29 = vld [vmem:[%s2611_s5 + $0x8] sm:$0xff] }
 0x17d   : > { %762 = vperm.xlu0 %1725, %v340_v30   ;;  %v2275_v30 = vld [vmem:[%s2610_s4 + $0x8] sm:$0xff] }
 0x17e   : > { %772 = vperm.xlu1 %1726, %v342_v33  }
 0x189   : > { %777 = vperm.xlu2 %1724, %v343_v50  }
 0x191   : > { %767 = vperm.xlu2 %1724, %v341_v32  }
 0x1d4   : > { %v855_v46 = vpop.xlane.xlu0 %854 }
 0x1d5   : > { %v868_v31 = vmul.f32 %v2247_v39, %v855_v46 }
 0x1d7   : > { %v872_v47 = vpack.c.bf16 %v868_v31, %v868_v31  ;;  %v858_v56 = vpop.xlane.xlu2 %857 }
 0x1d8   : > { %v869_v6 = vmul.f32 %v2247_v39, %v858_v56  ;;  %v849_v59 = vpop.xlane.xlu1 %848 }
 0x1d9   : > { %v880_v7 = vunpack.c.l.b16 %v872_v47  ;;  %v866_v9 = vmul.f32 %v2247_v39, %v849_v59 }
 0x1da   : > { %v873_v37 = vpack.c.bf16 %v869_v6, %v869_v6  ;;  %v2296_v6 = vld [vmem:[%s2612_s6 + $0x30] sm:$0xff] }
 0x1db   : > { %v870_v41 = vpack.c.bf16 %v866_v9, %v866_v9 }
 0x1dc   : > { %v881_v61 = vunpack.c.l.b16 %v873_v37 }
 0x1dd   : > { %v878_v1 = vunpack.c.l.b16 %v870_v41 }
 0x1de   : > { %v883_v8 = vpack.c.b16 %v881_v61, %v880_v7  ;;  %v2302_v61 = vld [vmem:[%s2612_s6 + $0x28] sm:$0xff] }
 0x1e0   : > { %895 = vmatpush.bf16.msrb.mxu0 %v883_v8  ;;  %v2307_v8 = vld [vmem:[%s2612_s6 + $0x38] sm:$0xff] }
 0x1e4   : > { %v852_v40 = vpop.xlane.xlu2 %851 }
 0x1e5   : > { %v867_v2 = vmul.f32 %v2247_v39, %v852_v40 }
 0x1e7   : > { %v871_v0 = vpack.c.bf16 %v867_v2, %v867_v2  ;;  %v705_v5 = vpop.permute.xlu0 %704  ;;  %v2314_v2 = vld [vmem:[%s2612_s6 + $0x20] sm:$0xff] }
 0x1e9   : > { %v879_v3 = vunpack.c.l.b16 %v871_v0 }
 0x1eb   : > { %v882_v62 = vpack.c.b16 %v879_v3, %v878_v1 }
 0x1ed   : > { %896 = vmatpush.bf16.msrb.mxu0 %v882_v62 }
 0x1ef   : > { %v763_v62 = vpop.permute.xlu0 %762 }
 0x1f0   : > { %1657 = vmatmul.msk.bf16.vlgmr.msrb.gmra.mxu0 %vm727_vm8, %v2256_v60 }
 0x1f5   : > { %v740_v42 = vpop.f32.mrf.mxu0 }
 0x1f6   : > { %v741_v4 = vadd.f32 %v740_v42, %v705_v5  ;;  %v753_v10 = vpop.f32.mrf.mxu1  ;;  %v778_v42 = vpop.permute.xlu2 %777 }
 0x1f7   : > { %v754_v11 = vadd.f32 %v753_v10, %v705_v5 }
 0x1f8   : > { %v757_v20 = vmax.f32 %v741_v4, 0.0  ;;  %v773_v4 = vpop.permute.xlu1 %772 }
 0x1f9   : > { %v758_v18 = vmax.f32 %v754_v11, 0.0 }
 0x1fb   : > { %v759_v23 = vpack.c.bf16 %v758_v18, %v757_v20 }
 0x1fd   : > { %v791_v24 = vunpack.c.l.b16 %v759_v23  ;;  %v792_v15 = vunpack.c.h.b16 %v759_v23  ;;  %v742_v25 = vpop.f32.mrf.mxu0 }
 0x1fe   : > { %v755_v28 = vpop.f32.mrf.mxu1 }
 0x1ff   : > { %v793_v26 = vpack.c.b16 %v791_v24, %v791_v24  ;;  %v794_v51 = vpack.c.b16 %v792_v15, %v792_v15  ;;  %v768_v28 = vpop.permute.xlu2 %767 }
 0x201   : > { %v804_v13 = vsel %vm802_vm10, %v793_v26, 0  ;;  %v807_v14 = vsel %vm802_vm10, %v794_v51, 0 }
 0x202   : > { %816 = vmatpush.bf16.msra.mxu2 %v804_v13  ;;  %835 = vmatpush.bf16.msra.mxu3 %v807_v14 }
 0x205   : > { %1653 = vmatmul.msk.bf16.vlgmr.msra.gmra.mxu2 %vm795_vm11, %v1706_v19  ;;  %1655 = vmatmul.msk.bf16.vlgmr.msra.gmra.mxu3 %vm795_vm11, %v1706_v19 }
 0x215   : > { %1654 = vmatmul.msk.bf16.gmra.mxu2 %vm795_vm11, %v1707_v29  ;;  %1656 = vmatmul.msk.bf16.gmra.mxu3 %vm795_vm11, %v1707_v29 }
 0x26d   : > { %v898_v33 = vpop.f32.mrf.mxu0 }
 0x26e   : > { %v899_v50 = vadd.f32 %v898_v33, %v2275_v30 }
 0x270   : > { %v902_v32 = vmax.f32 %v899_v50, 0.0 }
 0x272   : > { %v903_v54 = vpack.c.bf16 %v902_v32, %v902_v32 }
 0x274   : > { %v921_v35 = vsel %vm802_vm10, %v903_v54, 0 }
 0x275   : > { %v900_v27 = vpop.f32.mrf.mxu0  ;;  %930 = vmatpush.bf16.msrb.mxu1 %v921_v35  ;;  %1712 = vmatpush.bf16.msrb.mxu3 %v921_v35 }
 0x278   : > { %1667 = vmatmul.msk.bf16.vlgmr.msrb.gmra.mxu3 %vm795_vm11, %v2282_v38  ;;  %1666 = vmatmul.msk.bf16.vlgmr.msrb.gmra.mxu1 %vm795_vm11, %v2287_v43 }
 0x288   : > { %v837_v45 = vpop.f32.mrf.mxu3  ;;  %v818_v1 = vpop.f32.mrf.mxu2 }
 0x290   : > { %v839_v46 = vpop.f32.mrf.mxu3  ;;  %v820_v3 = vpop.f32.mrf.mxu2 }
 0x291   : > { %v821_v26 = vadd.f32 %v820_v3, %v768_v28  ;;  %v840_v14 = vadd.f32 %v839_v46, %v768_v28  ;;  %v819_v46 = vadd.f32 %v818_v1, %v763_v62  ;;  %v2333_v3 = vsub.f32 %v2192_v22, %v2176_v34 }
 0x292   : > { %v2344_v22 = vsub.f32 %v2186_v52, %v2198_v44 }
 0x298   : > { %v842_v31 = vpop.f32.mrf.mxu3  ;;  %v823_v5 = vpop.f32.mrf.mxu2 }
 0x299   : > { %v824_v10 = vadd.f32 %v823_v5, %v773_v4  ;;  %v843_v11 = vadd.f32 %v842_v31, %v773_v4 }
 0x2a0   : > { %v844_v47 = vpop.f32.mrf.mxu3  ;;  %v825_v25 = vpop.f32.mrf.mxu2 }
 0x2a1   : > { %v826_v51 = vadd.f32 %v825_v25, %v778_v42  ;;  %v845_v13 = vadd.f32 %v844_v47, %v778_v42 }
 0x2f5   : > { %v932_v56 = vpop.f32.mrf.mxu1 }
 0x2f6   : > { %v933_v0 = vadd.f32 %v932_v56, %v2314_v2 }
 0x2fb   : > { %v937_v7 = vpop.f32.mrf.mxu3 }
 0x2fc   : > { %v938_v37 = vadd.f32 %v937_v7, %v2296_v6 }
 0x2fd   : > { %v934_v59 = vpop.f32.mrf.mxu1 }
 0x2fe   : > { %954 = vperm.xlu0 %1725, %v938_v37   ;;  %v935_v9 = vadd.f32 %v934_v59, %v2302_v61 }
 0x303   : > { %v939_v40 = vpop.f32.mrf.mxu3 }
 0x304   : > { %v940_v41 = vadd.f32 %v939_v40, %v2307_v8 }
 0x306   : > { %959 = vperm.xlu1 %1726, %v940_v41   ;;  %949 = vperm.xlu0 %1725, %v935_v9   ;;  %v838_v9 = vadd.f32 %v837_v45, %v763_v62  ;;  %v2325_v41 = vsub.f32 %v2164_v48, %v2170_v53  ;;  %v2337_v45 = vsub.f32 %v2195_v36, %v2179_v55 }
 0x307   : > { %v2351_v36 = vsub.f32 %v2212_v12, %v2218_v49 }
 0x30e   : > { %944 = vperm.xlu1 %1726, %v933_v0   ;;  %v2329_v0 = vsub.f32 %v2167_v17, %v2173_v57 }
 0x370   : > { %v955_v20 = vpop.permute.xlu0 %954 }
 0x371   : > { %v966_v18 = vadd.f32 %v955_v20, %v824_v10  ;;  %v967_v23 = vadd.f32 %v955_v20, %v843_v11 }
 0x373   : > { %v1672_v24 = vmul.f32 -1.442695, %v966_v18  ;;  %v1673_v15 = vmul.f32 -1.442695, %v967_v23  ;;  %v2355_v18 = vsub.f32 %v2215_v58, %v2221_v16 }
 0x375   : > { %1767 = vpow2.f32 %v1672_v24 }
 0x376   : > { %1769 = vpow2.f32 %v1673_v15 }
 0x378   : > { %v960_v19 = vpop.permute.xlu1 %959  ;;  %v950_v29 = vpop.permute.xlu0 %949 }
 0x379   : > { %v968_v33 = vadd.f32 %v960_v19, %v826_v51  ;;  %v969_v50 = vadd.f32 %v960_v19, %v845_v13  ;;  %v964_v32 = vadd.f32 %v950_v29, %v821_v26  ;;  %v965_v54 = vadd.f32 %v950_v29, %v840_v14 }
 0x37b   : > { %v1768_v35 = vpop.eup %1767  ;;  %v1674_v27 = vmul.f32 -1.442695, %v968_v33  ;;  %v1675_v7 = vmul.f32 -1.442695, %v969_v50  ;;  %v1670_v59 = vmul.f32 -1.442695, %v964_v32 }
 0x37c   : > { %v1770_v31 = vpop.eup %1769  ;;  %v2317_v56 = vadd.f32 1.0, %v1768_v35  ;;  %v1671_v47 = vmul.f32 -1.442695, %v965_v54 }
 0x37d   : > { %v2319_v37 = vadd.f32 1.0, %v1770_v31  ;;  %1771 = vpow2.f32 %v1674_v27 }
 0x37e   : > { %1773 = vrcp.f32 %v2317_v56  ;;  %v1071_v62 = vand.u32 2147483647, %v2317_v56  ;;  %v1073_v48 = vand.u32 2147483648, %v2317_v56  ;;  %vm1067_vm12 = vweird.f32 %v2317_v56 }
 0x37f   : > { %1775 = vrcp.f32 %v2319_v37  ;;  %v1086_v10 = vand.u32 2147483647, %v2319_v37  ;;  %vm1082_vm13 = vweird.f32 %v2319_v37  ;;  %v1088_v52 = vand.u32 2147483648, %v2319_v37 }
 0x380   : > { %1777 = vpow2.f32 %v1675_v7  ;;  %v945_v40 = vpop.permute.xlu1 %944  ;;  %vm2362_vm14 = vcmp.eq.f32.partialorder %v1071_v62, 8.507059e+37  ;;  %v1074_v28 = vor.u32 1.1754944e-38, %v1073_v48 }
 0x381   : > { %1779 = vpow2.f32 %v1670_v59  ;;  %v962_v5 = vadd.f32 %v945_v40, %v819_v46  ;;  %v963_v1 = vadd.f32 %v945_v40, %v838_v9  ;;  %vm2368_vm15 = vcmp.eq.f32.partialorder %v1086_v10, 8.507059e+37 }
 0x382   : > { %1781 = vpow2.f32 %v1671_v47  ;;  %v1089_v27 = vor.u32 1.1754944e-38, %v1088_v52 }
 0x383   : > { %v1772_v42 = vpop.eup %1771  ;;  %v1668_v4 = vmul.f32 -1.442695, %v962_v5  ;;  %v1669_v17 = vmul.f32 -1.442695, %v963_v1 }
 0x384   : > { %v1774_v11 = vpop.eup %1773  ;;  %v2346_v20 = vadd.f32 1.0, %v1772_v42 }
 0x385   : > { %v1776_v23 = vpop.eup %1775  ;;  %v1063_v24 = vmul.f32 %v1774_v11, %v2317_v56  ;;  %1783 = vpow2.f32 %v1668_v4  ;;  %vm1068_vm0 = vweird.f32 %v1774_v11 }
 0x386   : > { %v1778_v15 = vpop.eup %1777  ;;  %v1078_v25 = vmul.f32 %v1776_v23, %v2319_v37  ;;  %1785 = vrcp.f32 %v2346_v20  ;;  %v1103_v33 = vand.u32 2147483648, %v2346_v20  ;;  %v1101_v54 = vand.u32 2147483647, %v2346_v20  ;;  %vm1069_vm3 = vmor %vm1067_vm12, %vm1068_vm0 }
 0x387   : > { %v1780_v58 = vpop.eup %1779  ;;  %v2366_v26 = vadd.f32 1.0, %v1778_v15  ;;  %1787 = vpow2.f32 %v1669_v17  ;;  %v1064_v51 = vsub.f32 1.0, %v1063_v24  ;;  %vm1083_vm1 = vweird.f32 %v1776_v23 }
 0x388   : > { %v1782_v14 = vpop.eup %1781  ;;  %v2372_v19 = vadd.f32 1.0, %v1780_v58  ;;  %v1079_v29 = vsub.f32 1.0, %v1078_v25  ;;  %vm1097_vm2 = vweird.f32 %v2346_v20  ;;  %v1104_v40 = vor.u32 1.1754944e-38, %v1103_v33  ;;  %vm1084_vm4 = vmor %vm1082_vm13, %vm1083_vm1 }
 0x389   : > { %1789 = vrcp.f32 %v2366_v26  ;;  %v2376_v50 = vadd.f32 1.0, %v1782_v14  ;;  %v1065_v32 = vmul.f32 %v1774_v11, %v1064_v51  ;;  %v1118_v59 = vand.u32 2147483648, %v2366_v26 }
 0x38a   : > { %1791 = vrcp.f32 %v2372_v19  ;;  %v1080_v35 = vmul.f32 %v1776_v23, %v1079_v29  ;;  %v1116_v5 = vand.u32 2147483647, %v2366_v26  ;;  %vm2393_vm6 = vcmp.eq.f32.partialorder %v1101_v54, 8.507059e+37 }
 0x38b   : > { %v1784_v31 = vpop.eup %1783  ;;  %1793 = vrcp.f32 %v2376_v50  ;;  %v1066_v7 = vadd.f32 %v1774_v11, %v1065_v32  ;;  %v1041_v56 = vand.u32 2147483647, %v2372_v19  ;;  %vm1112_vm7 = vweird.f32 %v2366_v26 }
 0x38c   : > { %v1786_v47 = vpop.eup %1785  ;;  %v2383_v46 = vadd.f32 1.0, %v1784_v31  ;;  %v1081_v9 = vadd.f32 %v1776_v23, %v1080_v35  ;;  %v1119_v15 = vor.u32 1.1754944e-38, %v1118_v59  ;;  %vm1037_vm9 = vweird.f32 %v2372_v19 }
 0x38d   : > { %v1788_v1 = vpop.eup %1787  ;;  %v1093_v62 = vmul.f32 %v1786_v47, %v2346_v20  ;;  %v1070_v48 = vsel %vm1069_vm3, %v1774_v11, %v1066_v7  ;;  %vm1098_vm5 = vweird.f32 %v1786_v47  ;;  %vm2411_vm13 = vcmp.eq.f32.partialorder %v1116_v5, 8.507059e+37 }
 0x38e   : > { %v2398_v4 = vadd.f32 1.0, %v1788_v1  ;;  %1795 = vrcp.f32 %v2383_v46  ;;  %v1075_v17 = vsel %vm2362_vm14, %v1074_v28, %v1070_v48  ;;  %v1085_v10 = vsel %vm1084_vm4, %v1776_v23, %v1081_v9  ;;  %vm1099_vm1 = vmor %vm1097_vm2, %vm1098_vm5 }
 0x38f   : > { %v1790_v11 = vpop.eup %1789  ;;  %v1090_v37 = vsel %vm2368_vm15, %v1089_v27, %v1085_v10  ;;  %v1126_v24 = vmul.f32 %v1075_v17, %v2325_v41  ;;  %v1094_v52 = vsub.f32 1.0, %v1093_v62  ;;  %vm2419_vm15 = vcmp.eq.f32.partialorder %v1041_v56, 8.507059e+37 }
 0x390   : > { %v1792_v25 = vpop.eup %1791  ;;  %v1108_v58 = vmul.f32 %v1790_v11, %v2366_v26  ;;  %1797 = vrcp.f32 %v2398_v4  ;;  %v1127_v12 = vmul.f32 %v1090_v37, %v2329_v0  ;;  %vm1113_vm12 = vweird.f32 %v1790_v11 }
 0x391   : > { %v1794_v28 = vpop.eup %1793  ;;  %v1033_v51 = vmul.f32 %v1792_v25, %v2372_v19  ;;  %v1134_v13 = vadd.f32 %v1126_v24, %v2170_v53  ;;  %v1095_v14 = vmul.f32 %v1786_v47, %v1094_v52  ;;  %vm1038_vm14 = vweird.f32 %v1792_v25  ;;  %vm1114_vm2 = vmor %vm1112_vm7, %vm1113_vm12 }
 0x392   : > { %v1048_v29 = vmul.f32 %v1794_v28, %v2376_v50  ;;  %v1135_v33 = vadd.f32 %v1127_v12, %v2173_v57  ;;  %v1109_v32 = vsub.f32 1.0, %v1108_v58  ;;  %v1043_v31 = vand.u32 2147483648, %v2372_v19  ;;  %vm1039_vm4 = vmor %vm1037_vm9, %vm1038_vm14 }
 0x393   : > { %v1096_v35 = vadd.f32 %v1786_v47, %v1095_v14  ;;  %v1034_v27 = vsub.f32 1.0, %v1033_v51  ;;  %vm1052_vm0 = vweird.f32 %v2376_v50  ;;  %vm1053_vm3 = vweird.f32 %v1794_v28 }
 0x394   : > { %v2425_v7 = vpop.eup %1795  ;;  %v1290_v59 = vadd.f32 %v1135_v33, %v1134_v13  ;;  %v1110_v9 = vmul.f32 %v1790_v11, %v1109_v32  ;;  %v1049_v5 = vsub.f32 1.0, %v1048_v29  ;;  %v1044_v56 = vor.u32 1.1754944e-38, %v1043_v31 }
 0x395   : > { %v1003_v1 = vmul.f32 %v2425_v7, %v2383_v46  ;;  %v1100_v62 = vsel %vm1099_vm1, %v1786_v47, %v1096_v35  ;;  %v1035_v48 = vmul.f32 %v1792_v25, %v1034_v27  ;;  %v1056_v20 = vand.u32 2147483647, %v2376_v50 }
 0x396   : > { %v2432_v17 = vpop.eup %1797  ;;  %1291 = vadd.xlane.f32.xlu2 %v1290_v59  ;;  %v1105_v10 = vsel %vm2393_vm6, %v1104_v40, %v1100_v62  ;;  %v1111_v37 = vadd.f32 %v1790_v11, %v1110_v9  ;;  %v1050_v24 = vmul.f32 %v1794_v28, %v1049_v5  ;;  %v1058_v12 = vand.u32 2147483648, %v2376_v50  ;;  %vm1054_vm6 = vmor %vm1052_vm0, %vm1053_vm3 }
 0x397   : > { %v1018_v52 = vmul.f32 %v2432_v17, %v2398_v4  ;;  %v1128_v47 = vmul.f32 %v1105_v10, %v2333_v3  ;;  %v1036_v58 = vadd.f32 %v1792_v25, %v1035_v48  ;;  %vm1057_vm5 = vcmp.eq.f32.partialorder %v1056_v20, 8.507059e+37 }
 0x398   : > { %v1115_v51 = vsel %vm1114_vm2, %v1790_v11, %v1111_v37  ;;  %v1051_v40 = vadd.f32 %v1794_v28, %v1050_v24  ;;  %v1140_v42 = vpack.c.bf16 %v1135_v33, %v1134_v13  ;;  %v1059_v32 = vor.u32 1.1754944e-38, %v1058_v12 }
 0x399   : > { %v1120_v14 = vsel %vm2411_vm13, %v1119_v15, %v1115_v51  ;;  %v1136_v29 = vadd.f32 %v1128_v47, %v2176_v34  ;;  %v1040_v26 = vsel %vm1039_vm4, %v1792_v25, %v1036_v58  ;;  %v1004_v15 = vsub.f32 1.0, %v1003_v1 }
 0x39a   : > { %v1129_v11 = vmul.f32 %v1120_v14, %v2337_v45  ;;  %v1045_v19 = vsel %vm2419_vm15, %v1044_v56, %v1040_v26  ;;  %v1055_v35 = vsel %vm1054_vm6, %v1794_v28, %v1051_v40  ;;  %v1155_v27 = vunpack.c.l.b16 %v1140_v42 }
 0x39b   : > { %v1060_v31 = vsel %vm1057_vm5, %v1059_v32, %v1055_v35  ;;  %v1124_v13 = vmul.f32 %v1045_v19, %v2351_v36  ;;  %v1156_v23 = vunpack.c.h.b16 %v1140_v42  ;;  %vm1007_vm7 = vweird.f32 %v2383_v46 }
 0x39c   : > { %v1137_v33 = vadd.f32 %v1129_v11, %v2179_v55  ;;  %v1125_v25 = vmul.f32 %v1060_v31, %v2355_v18  ;;  %vm1008_vm9 = vweird.f32 %v2425_v7  ;;  %v1005_v54 = vmul.f32 %v2425_v7, %v1004_v15 }
 0x39d   : > { %v1132_v50 = vadd.f32 %v1124_v13, %v2218_v49  ;;  %v1011_v28 = vand.u32 2147483647, %v2383_v46  ;;  %v1013_v59 = vand.u32 2147483648, %v2383_v46  ;;  %v1019_v62 = vsub.f32 1.0, %v1018_v52  ;;  %vm1009_vm14 = vmor %vm1007_vm7, %vm1008_vm9 }
 0x39e   : > { %v1293_v9 = vadd.f32 %v1137_v33, %v1136_v29  ;;  %v1133_v5 = vadd.f32 %v1125_v25, %v2221_v16  ;;  %v1141_v1 = vpack.c.bf16 %v1137_v33, %v1136_v29  ;;  %v1006_v48 = vadd.f32 %v2425_v7, %v1005_v54  ;;  %v349_v54 = vld [vmem:[%s2612_s6 + $0x48] sm:$0xff] }
 0x39f   : > { %vm2467_vm12 = vcmp.eq.f32.partialorder %v1011_v28, 8.507059e+37  ;;  %v1014_v10 = vor.u32 1.1754944e-38, %v1013_v59  ;;  %vm1022_vm13 = vweird.f32 %v2398_v4  ;;  %v1020_v52 = vmul.f32 %v2432_v17, %v1019_v62  ;;  %v348_v28 = vld [vmem:[%s2612_s6 + $0x40] sm:$0xff]  ;;  %v351_v59 = vld [vmem:[%s2612_s6 + $0x58] sm:$0xff] }
 0x3a0   : > { %1294 = vadd.xlane.f32.xlu1 %v1293_v9  ;;  %v1287_v37 = vadd.f32 %v1133_v5, %v1132_v50  ;;  %v1157_v24 = vunpack.c.l.b16 %v1141_v1  ;;  %v1158_v20 = vunpack.c.h.b16 %v1141_v1  ;;  %v1010_v47 = vsel %vm1009_vm14, %v2425_v7, %v1006_v48  ;;  %v350_v9 = vld [vmem:[%s2612_s6 + $0x50] sm:$0xff] }
 0x3a1   : > { %vm1023_vm15 = vweird.f32 %v2432_v17  ;;  %v1026_v58 = vand.u32 2147483647, %v2398_v4  ;;  %v1028_v12 = vand.u32 2147483648, %v2398_v4  ;;  %v1015_v42 = vsel %vm2467_vm12, %v1014_v10, %v1010_v47 }
 0x3a2   : > { %1288 = vadd.xlane.f32.xlu2 %v1287_v37  ;;  %v1161_v51 = vpack.c.b16 %v1157_v24, %v1155_v27  ;;  %v1162_v40 = vpack.c.b16 %v1158_v20, %v1156_v23  ;;  %v1021_v14 = vadd.f32 %v2432_v17, %v1020_v52  ;;  %vm1024_vm0 = vmor %vm1022_vm13, %vm1023_vm15  ;;  %v1122_v7 = vmul.f32 %v1015_v42, %v2344_v22 }
 0x3a3   : > { %v1029_v46 = vor.u32 1.1754944e-38, %v1028_v12  ;;  %v2489_v29 = vsub.f32 %v2189_v21, %v2201_v63  ;;  %vm1027_vm1 = vcmp.eq.f32.partialorder %v1026_v58, 8.507059e+37  ;;  %v1139_v35 = vpack.c.bf16 %v1133_v5, %v1132_v50  ;;  %v327_v50 = vld [vmem:[%s2610_s4 + $0x10] sm:$0xff] }
 0x3a4   : > { %1176 = vmatpush.bf16.msrb.mxu2 %v1161_v51  ;;  %1189 = vmatpush.bf16.msra.mxu3 %v1162_v40  ;;  %v1025_v26 = vsel %vm1024_vm0, %v2432_v17, %v1021_v14  ;;  %v1130_v19 = vadd.f32 %v1122_v7, %v2198_v44  ;;  %v324_v17 = vld [vmem:[%s2609_s3 + $0x8] sm:$0xf] }
 0x3a5   : > { %v1030_v32 = vsel %vm1027_vm1, %v1029_v46, %v1025_v26  ;;  %v1153_v23 = vunpack.c.l.b16 %v1139_v35  ;;  %v1154_v33 = vunpack.c.h.b16 %v1139_v35 }
 0x3a6   : > { %v1123_v11 = vmul.f32 %v1030_v32, %v2489_v29 }
 0x3a8   : > { %v1131_v4 = vadd.f32 %v1123_v11, %v2201_v63 }
 0x3aa   : > { %v1284_v27 = vadd.f32 %v1131_v4, %v1130_v19  ;;  %v1138_v31 = vpack.c.bf16 %v1131_v4, %v1130_v19 }
 0x3ac   : > { %1285 = vadd.xlane.f32.xlu0 %v1284_v27  ;;  %v1151_v13 = vunpack.c.l.b16 %v1138_v31  ;;  %v1152_v15 = vunpack.c.h.b16 %v1138_v31 }
 0x3ae   : > { %v1159_v21 = vpack.c.b16 %v1153_v23, %v1151_v13  ;;  %v1160_v25 = vpack.c.b16 %v1154_v33, %v1152_v15 }
 0x3b0   : > { %1177 = vmatpush.bf16.msrb.mxu2 %v1159_v21  ;;  %1190 = vmatpush.bf16.msra.mxu3 %v1160_v25 }
 0x3b3   : > { %1676 = vmatmul.msk.bf16.vlgmr.msrb.gmra.mxu2 %vm727_vm8, %v324_v17  ;;  %1677 = vmatmul.msk.bf16.vlgmr.msra.gmra.mxu3 %vm727_vm8, %v324_v17  ;;  %v1711_v17 = vld [vmem:[%s2611_s5 + $0x28] sm:$0xff] }
 0x3b9   : > { %1144 = vperm.xlu1 %1726, %v327_v50  }
 0x3ba   : > { %1206 = vperm.xlu2 %1724, %v349_v54  }
 0x3c0   : > { %1201 = vperm.xlu0 %1725, %v348_v28  }
 0x3c1   : > { %1216 = vperm.xlu1 %1726, %v351_v59  }
 0x3c8   : > { %1211 = vperm.xlu0 %1725, %v350_v9  }
 0x409   : > { %v1292_v5 = vpop.xlane.xlu2 %1291 }
 0x40a   : > { %v1298_v1 = vmul.f32 %v1292_v5, %v2247_v39 }
 0x40c   : > { %v1302_v48 = vpack.c.bf16 %v1298_v1, %v1298_v1 }
 0x40e   : > { %v1310_v37 = vunpack.c.l.b16 %v1302_v48 }
 0x413   : > { %v1295_v62 = vpop.xlane.xlu1 %1294 }
 0x414   : > { %v1299_v56 = vmul.f32 %v1295_v62, %v2247_v39 }
 0x415   : > { %v1289_v20 = vpop.xlane.xlu2 %1288 }
 0x416   : > { %v1303_v10 = vpack.c.bf16 %v1299_v56, %v1299_v56  ;;  %v1297_v47 = vmul.f32 %v1289_v20, %v2247_v39 }
 0x418   : > { %v1311_v24 = vunpack.c.l.b16 %v1303_v10  ;;  %v1301_v12 = vpack.c.bf16 %v1297_v47, %v1297_v47 }
 0x41a   : > { %v1313_v52 = vpack.c.b16 %v1311_v24, %v1310_v37  ;;  %v1309_v42 = vunpack.c.l.b16 %v1301_v12 }
 0x41c   : > { %1322 = vmatpush.bf16.msrb.mxu3 %v1313_v52 }
 0x41d   : > { %v1207_v52 = vpop.permute.xlu2 %1206 }
 0x41f   : > { %v1286_v58 = vpop.xlane.xlu0 %1285 }
 0x420   : > { %v1296_v51 = vmul.f32 %v1286_v58, %v2247_v39 }
 0x422   : > { %v1300_v40 = vpack.c.bf16 %v1296_v51, %v1296_v51 }
 0x424   : > { %v1308_v14 = vunpack.c.l.b16 %v1300_v40 }
 0x426   : > { %v1312_v46 = vpack.c.b16 %v1309_v42, %v1308_v14 }
 0x428   : > { %1323 = vmatpush.bf16.msrb.mxu3 %v1312_v46 }
 0x42b   : > { %1690 = vmatmul.msk.bf16.vlgmr.msrb.gmra.mxu3 %vm727_vm8, %v2256_v60  ;;  %v1145_v7 = vpop.permute.xlu1 %1144  ;;  %v1710_v60 = vld [vmem:[%s2611_s5 + $0x20] sm:$0xff] }
 0x436   : > { %v1179_v26 = vpop.f32.mrf.mxu2  ;;  %v1192_v32 = vpop.f32.mrf.mxu3 }
 0x437   : > { %v1180_v11 = vadd.f32 %v1179_v26, %v1145_v7  ;;  %v1193_v19 = vadd.f32 %v1192_v32, %v1145_v7 }
 0x439   : > { %v1196_v4 = vmax.f32 %v1180_v11, 0.0  ;;  %v1197_v35 = vmax.f32 %v1193_v19, 0.0 }
 0x43b   : > { %v1198_v27 = vpack.c.bf16 %v1197_v35, %v1196_v4 }
 0x43d   : > { %v1230_v31 = vunpack.c.l.b16 %v1198_v27  ;;  %v1231_v13 = vunpack.c.h.b16 %v1198_v27 }
 0x43e   : > { %v1194_v23 = vpop.f32.mrf.mxu3  ;;  %v1181_v39 = vpop.f32.mrf.mxu2 }
 0x43f   : > { %v1232_v15 = vpack.c.b16 %v1230_v31, %v1230_v31  ;;  %v1233_v33 = vpack.c.b16 %v1231_v13, %v1231_v13  ;;  %v1217_v31 = vpop.permute.xlu1 %1216 }
 0x441   : > { %v1241_v21 = vsel %vm802_vm10, %v1232_v15, 0  ;;  %v1244_v25 = vsel %vm802_vm10, %v1233_v33, 0 }
 0x442   : > { %1253 = vmatpush.bf16.msra.mxu0 %v1241_v21  ;;  %1272 = vmatpush.bf16.msra.mxu2 %v1244_v25 }
 0x445   : > { %1686 = vmatmul.msk.bf16.vlgmr.msra.gmra.mxu0 %vm795_vm11, %v1710_v60  ;;  %1688 = vmatmul.msk.bf16.vlgmr.msra.gmra.mxu2 %vm795_vm11, %v1710_v60 }
 0x455   : > { %1687 = vmatmul.msk.bf16.gmra.mxu0 %vm795_vm11, %v1711_v17  ;;  %1689 = vmatmul.msk.bf16.gmra.mxu2 %vm795_vm11, %v1711_v17 }
 0x4ae   : > { %v1325_v50 = vpop.f32.mrf.mxu3 }
 0x4af   : > { %v1326_v54 = vadd.f32 %v1325_v50, %v2275_v30 }
 0x4b1   : > { %v1329_v28 = vmax.f32 %v1326_v54, 0.0 }
 0x4b3   : > { %v1330_v59 = vpack.c.bf16 %v1329_v28, %v1329_v28 }
 0x4b5   : > { %v1332_v9 = vsel %vm802_vm10, %v1330_v59, 0 }
 0x4b6   : > { %1341 = vmatpush.bf16.msra.mxu1 %v1332_v9  ;;  %v1327_v5 = vpop.f32.mrf.mxu3 }
 0x4b9   : > { %1691 = vmatmul.msk.bf16.vlgmr.msra.gmra.mxu1 %vm795_vm11, %v2287_v43 }
 0x4c2   : > { %v1255_v43 = vpop.f32.mrf.mxu0 }
 0x4c8   : > { %v1274_v20 = vpop.f32.mrf.mxu2 }
 0x4c9   : > { %1692 = vmatmul.msk.bf16.gmra.mxu1 %vm795_vm11, %v2282_v38  ;;  %v1202_v38 = vpop.permute.xlu0 %1201 }
 0x4ca   : > { %v1256_v47 = vadd.f32 %v1255_v43, %v1202_v38  ;;  %v1275_v58 = vadd.f32 %v1274_v20, %v1202_v38 }
 0x4d0   : > { %v1276_v12 = vpop.f32.mrf.mxu2 }
 0x4d1   : > { %v1212_v33 = vpop.permute.xlu0 %1211  ;;  %v1277_v38 = vadd.f32 %v1276_v12, %v1207_v52 }
 0x4d8   : > { %v2545_v46 = vpop.f32.mrf.mxu2 }
 0x4e0   : > { %v1281_v4 = vpop.f32.mrf.mxu2 }
 0x4e1   : > { %v1282_v39 = vadd.f32 %v1281_v4, %v1217_v31 }
 0x536   : > { %v1343_v1 = vpop.f32.mrf.mxu1 }
 0x537   : > { %v1344_v62 = vadd.f32 %v1343_v1, %v2314_v2  ;;  %v1257_v2 = vpop.f32.mrf.mxu0 }
 0x538   : > { %v1258_v20 = vadd.f32 %v1257_v2, %v1207_v52 }
 0x539   : > { %1355 = vperm.xlu2 %1724, %v1344_v62  }
 0x53e   : > { %v1345_v48 = vpop.f32.mrf.mxu1 }
 0x53f   : > { %v1346_v56 = vadd.f32 %v1345_v48, %v2302_v61 }
 0x541   : > { %1360 = vperm.xlu0 %1725, %v1346_v56  }
 0x546   : > { %v1348_v30 = vpop.f32.mrf.mxu1 }
 0x547   : > { %v1349_v10 = vadd.f32 %v1348_v30, %v2296_v6  ;;  %v2543_v6 = vpop.f32.mrf.mxu0 }
 0x549   : > { %1365 = vperm.xlu1 %1726, %v1349_v10  }
 0x54e   : > { %v1350_v37 = vpop.f32.mrf.mxu1 }
 0x54f   : > { %v1351_v24 = vadd.f32 %v1350_v37, %v2307_v8  ;;  %v1262_v19 = vpop.f32.mrf.mxu0 }
 0x550   : > { %v1263_v23 = vadd.f32 %v1262_v19, %v1217_v31 }
 0x551   : > { %1370 = vperm.xlu2 %1724, %v1351_v24  }
 0x593   : > { %v1356_v51 = vpop.permute.xlu2 %1355 }
 0x594   : > { %v1373_v40 = vadd.f32 %v1356_v51, %v1256_v47  ;;  %v1374_v61 = vadd.f32 %v1356_v51, %v1275_v58 }
 0x596   : > { %v1693_v42 = vmul.f32 -1.442695, %v1373_v40  ;;  %v1694_v14 = vmul.f32 -1.442695, %v1374_v61 }
 0x598   : > { %1799 = vpow2.f32 %v1693_v42 }
 0x599   : > { %1801 = vpow2.f32 %v1694_v14 }
 0x59e   : > { %v1800_v8 = vpop.eup %1799 }
 0x59f   : > { %v1802_v7 = vpop.eup %1801  ;;  %v1405_v26 = vadd.f32 1.0, %v1800_v8 }
 0x5a0   : > { %v1406_v32 = vadd.f32 1.0, %v1802_v7 }
 0x5a1   : > { %1803 = vrcp.f32 %v1405_v26  ;;  %v1422_v21 = vand.u32 2147483647, %v1405_v26  ;;  %v1424_v25 = vand.u32 2147483648, %v1405_v26  ;;  %vm1418_vm11 = vweird.f32 %v1405_v26 }
 0x5a2   : > { %1805 = vrcp.f32 %v1406_v32  ;;  %v1439_v17 = vand.u32 2147483648, %v1406_v32  ;;  %v1437_v5 = vand.u32 2147483647, %v1406_v32  ;;  %vm1433_vm2 = vweird.f32 %v1406_v32 }
 0x5a3   : > { %v1425_v56 = vor.u32 1.1754944e-38, %v1424_v25  ;;  %vm1423_vm4 = vcmp.eq.f32.partialorder %v1422_v21, 8.507059e+37 }
 0x5a4   : > { %v1440_v37 = vor.u32 1.1754944e-38, %v1439_v17  ;;  %vm1438_vm6 = vcmp.eq.f32.partialorder %v1437_v5, 8.507059e+37 }
 0x5a7   : > { %v1804_v11 = vpop.eup %1803 }
 0x5a8   : > { %v1806_v35 = vpop.eup %1805  ;;  %v1414_v27 = vmul.f32 %v1804_v11, %v1405_v26  ;;  %vm1419_vm8 = vweird.f32 %v1804_v11 }
 0x5a9   : > { %v1429_v13 = vmul.f32 %v1806_v35, %v1406_v32  ;;  %vm1434_vm10 = vweird.f32 %v1806_v35  ;;  %vm1420_vm3 = vmor %vm1418_vm11, %vm1419_vm8 }
 0x5aa   : > { %v1415_v15 = vsub.f32 1.0, %v1414_v27  ;;  %vm1435_vm5 = vmor %vm1433_vm2, %vm1434_vm10 }
 0x5ab   : > { %v1430_v60 = vsub.f32 1.0, %v1429_v13  ;;  %v1371_v50 = vpop.permute.xlu2 %1370 }
 0x5ac   : > { %v1416_v54 = vmul.f32 %v1804_v11, %v1415_v15  ;;  %v1379_v28 = vadd.f32 %v1371_v50, %v1263_v23  ;;  %v1380_v59 = vadd.f32 %v1371_v50, %v1282_v39 }
 0x5ad   : > { %v1431_v9 = vmul.f32 %v1806_v35, %v1430_v60 }
 0x5ae   : > { %v1417_v1 = vadd.f32 %v1804_v11, %v1416_v54  ;;  %v1699_v62 = vmul.f32 -1.442695, %v1379_v28  ;;  %v1700_v48 = vmul.f32 -1.442695, %v1380_v59 }
 0x5af   : > { %v1432_v30 = vadd.f32 %v1806_v35, %v1431_v9 }
 0x5b0   : > { %v1421_v10 = vsel %vm1420_vm3, %v1804_v11, %v1417_v1  ;;  %1807 = vpow2.f32 %v1699_v62 }
 0x5b1   : > { %v1426_v24 = vsel %vm1423_vm4, %v1425_v56, %v1421_v10  ;;  %v1436_v43 = vsel %vm1435_vm5, %v1806_v35, %v1432_v30  ;;  %1809 = vpow2.f32 %v1700_v48 }
 0x5b2   : > { %v1441_v47 = vsel %vm1438_vm6, %v1440_v37, %v1436_v43  ;;  %v1533_v58 = vmul.f32 %v1426_v24, %v2344_v22 }
 0x5b3   : > { %v1534_v51 = vmul.f32 %v1441_v47, %v2489_v29  ;;  %v1361_v40 = vpop.permute.xlu0 %1360 }
 0x5b4   : > { %v1541_v61 = vadd.f32 %v1533_v58, %v2198_v44  ;;  %v1375_v42 = vadd.f32 %v1361_v40, %v1258_v20  ;;  %v1376_v14 = vadd.f32 %v1361_v40, %v1277_v38  ;;  %v1261_v44 = vadd.f32 %v2543_v6, %v1212_v33 }
 0x5b5   : > { %v1542_v8 = vadd.f32 %v1534_v51, %v2201_v63  ;;  %v1280_v63 = vadd.f32 %v2545_v46, %v1212_v33 }
 0x5b6   : > { %v1808_v7 = vpop.eup %1807  ;;  %v1695_v52 = vmul.f32 -1.442695, %v1375_v42  ;;  %v1696_v26 = vmul.f32 -1.442695, %v1376_v14 }
 0x5b7   : > { %v1810_v2 = vpop.eup %1809  ;;  %v1549_v12 = vpack.c.bf16 %v1542_v8, %v1541_v61  ;;  %v1411_v22 = vadd.f32 1.0, %v1808_v7 }
 0x5b8   : > { %v1412_v29 = vadd.f32 1.0, %v1810_v2  ;;  %1811 = vpow2.f32 %v1695_v52 }
 0x5b9   : > { %1553 = vst [vmem:[%s2555_s21] sm:$0xff] %v1549_v12  ;;  %1813 = vrcp.f32 %v1411_v22  ;;  %v1512_v46 = vand.u32 2147483647, %v1411_v22  ;;  %v1514_v25 = vand.u32 2147483648, %v1411_v22  ;;  %vm1508_vm12 = vweird.f32 %v1411_v22 }
 0x5ba   : > { %1815 = vrcp.f32 %v1412_v29  ;;  %v1527_v17 = vand.u32 2147483647, %v1412_v29  ;;  %v1529_v54 = vand.u32 2147483648, %v1412_v29  ;;  %vm1523_vm13 = vweird.f32 %v1412_v29 }
 0x5bb   : > { %1817 = vpow2.f32 %v1696_v26  ;;  %v1366_v32 = vpop.permute.xlu1 %1365  ;;  %vm1513_vm15 = vcmp.eq.f32.partialorder %v1512_v46, 8.507059e+37  ;;  %v1515_v1 = vor.u32 1.1754944e-38, %v1514_v25 }
 0x5bc   : > { %v1377_v11 = vadd.f32 %v1366_v32, %v1261_v44  ;;  %v1378_v19 = vadd.f32 %v1366_v32, %v1280_v63  ;;  %vm1528_vm1 = vcmp.eq.f32.partialorder %v1527_v17, 8.507059e+37  ;;  %v1530_v30 = vor.u32 1.1754944e-38, %v1529_v54 }
 0x5be   : > { %v1812_v4 = vpop.eup %1811  ;;  %v1697_v35 = vmul.f32 -1.442695, %v1377_v11  ;;  %v1698_v13 = vmul.f32 -1.442695, %v1378_v19 }
 0x5bf   : > { %v1814_v27 = vpop.eup %1813  ;;  %v2560_v31 = vadd.f32 1.0, %v1812_v4 }
 0x5c0   : > { %v1816_v23 = vpop.eup %1815  ;;  %v1504_v39 = vmul.f32 %v1814_v27, %v1411_v22  ;;  %1819 = vpow2.f32 %v1697_v35  ;;  %vm1509_vm7 = vweird.f32 %v1814_v27 }
 0x5c1   : > { %v1818_v15 = vpop.eup %1817  ;;  %v1519_v21 = vmul.f32 %v1816_v23, %v1412_v29  ;;  %1821 = vrcp.f32 %v2560_v31  ;;  %vm1524_vm9 = vweird.f32 %v1816_v23  ;;  %vm1510_vm14 = vmor %vm1508_vm12, %vm1509_vm7  ;;  %v1454_v20 = vand.u32 2147483648, %v2560_v31 }
 0x5c2   : > { %v1505_v6 = vsub.f32 1.0, %v1504_v39  ;;  %v2563_v33 = vadd.f32 1.0, %v1818_v15  ;;  %1823 = vpow2.f32 %v1698_v13  ;;  %vm1525_vm0 = vmor %vm1523_vm13, %vm1524_vm9  ;;  %v1452_v42 = vand.u32 2147483647, %v2560_v31 }
 0x5c3   : > { %v1520_v60 = vsub.f32 1.0, %v1519_v21  ;;  %vm1448_vm10 = vweird.f32 %v2560_v31  ;;  %v1455_v12 = vor.u32 1.1754944e-38, %v1454_v20 }
 0x5c4   : > { %v1506_v50 = vmul.f32 %v1814_v27, %v1505_v6  ;;  %1825 = vrcp.f32 %v2563_v33  ;;  %vm1453_vm2 = vcmp.eq.f32.partialorder %v1452_v42, 8.507059e+37  ;;  %vm1463_vm4 = vweird.f32 %v2563_v33 }
 0x5c5   : > { %v1521_v28 = vmul.f32 %v1816_v23, %v1520_v60 }
 0x5c6   : > { %v1820_v59 = vpop.eup %1819  ;;  %v1507_v9 = vadd.f32 %v1814_v27, %v1506_v50 }
 0x5c7   : > { %v1822_v5 = vpop.eup %1821  ;;  %v1522_v62 = vadd.f32 %v1816_v23, %v1521_v28  ;;  %v2566_v48 = vadd.f32 1.0, %v1820_v59 }
 0x5c8   : > { %v1511_v56 = vsel %vm1510_vm14, %v1814_v27, %v1507_v9  ;;  %v1444_v10 = vmul.f32 %v1822_v5, %v2560_v31  ;;  %v1824_v37 = vpop.eup %1823  ;;  %vm1449_vm8 = vweird.f32 %v1822_v5 }
 0x5c9   : > { %v1516_v24 = vsel %vm1513_vm15, %v1515_v1, %v1511_v56  ;;  %v1526_v43 = vsel %vm1525_vm0, %v1816_v23, %v1522_v62  ;;  %1827 = vrcp.f32 %v2566_v48  ;;  %v2572_v40 = vadd.f32 1.0, %v1824_v37  ;;  %vm1450_vm11 = vmor %vm1448_vm10, %vm1449_vm8 }
 0x5ca   : > { %v1826_v38 = vpop.eup %1825  ;;  %v1531_v47 = vsel %vm1528_vm1, %v1530_v30, %v1526_v43  ;;  %v1539_v58 = vmul.f32 %v1516_v24, %v2333_v3  ;;  %v1445_v51 = vsub.f32 1.0, %v1444_v10  ;;  %v1484_v27 = vand.u32 2147483648, %v2566_v48 }
 0x5cb   : > { %v1540_v61 = vmul.f32 %v1531_v47, %v2337_v45  ;;  %v1459_v14 = vmul.f32 %v1826_v38, %v2563_v33  ;;  %1829 = vrcp.f32 %v2572_v40  ;;  %v1469_v45 = vand.u32 2147483648, %v2563_v33 }
 0x5cc   : > { %v1547_v8 = vadd.f32 %v1539_v58, %v2176_v34  ;;  %v1446_v7 = vmul.f32 %v1822_v5, %v1445_v51  ;;  %vm1464_vm3 = vweird.f32 %v1826_v38  ;;  %v1467_v34 = vand.u32 2147483647, %v2563_v33 }
 0x5cd   : > { %v1548_v52 = vadd.f32 %v1540_v61, %v2179_v55  ;;  %v1460_v2 = vsub.f32 1.0, %v1459_v14  ;;  %vm1465_vm5 = vmor %vm1463_vm4, %vm1464_vm3  ;;  %v1470_v19 = vor.u32 1.1754944e-38, %v1469_v45  ;;  %v1482_v15 = vand.u32 2147483647, %v2566_v48 }
 0x5ce   : > { %v1447_v3 = vadd.f32 %v1822_v5, %v1446_v7  ;;  %vm1468_vm6 = vcmp.eq.f32.partialorder %v1467_v34, 8.507059e+37  ;;  %vm1478_vm9 = vweird.f32 %v2566_v48  ;;  %v1499_v25 = vand.u32 2147483648, %v2572_v40 }
 0x5cf   : > { %v1828_v22 = vpop.eup %1827  ;;  %v1552_v26 = vpack.c.bf16 %v1548_v52, %v1547_v8  ;;  %v1461_v29 = vmul.f32 %v1826_v38, %v1460_v2  ;;  %v1497_v50 = vand.u32 2147483647, %v2572_v40  ;;  %vm1483_vm14 = vcmp.eq.f32.partialorder %v1482_v15, 8.507059e+37 }
 0x5d0   : > { %v1451_v44 = vsel %vm1450_vm11, %v1822_v5, %v1447_v3  ;;  %v1474_v63 = vmul.f32 %v1828_v22, %v2566_v48  ;;  %vm1479_vm7 = vweird.f32 %v1828_v22  ;;  %vm1493_vm15 = vweird.f32 %v2572_v40 }
 0x5d1   : > { %1556 = vst [vmem:[%s2555_s21 + $0x18] sm:$0xff] %v1552_v26  ;;  %v1456_v55 = vsel %vm1453_vm2, %v1455_v12, %v1451_v44  ;;  %v1462_v32 = vadd.f32 %v1826_v38, %v1461_v29  ;;  %v1830_v11 = vpop.eup %1829  ;;  %vm1480_vm12 = vmor %vm1478_vm9, %vm1479_vm7  ;;  %v1500_v59 = vor.u32 1.1754944e-38, %v1499_v25  ;;  %vm1498_vm1 = vcmp.eq.f32.partialorder %v1497_v50, 8.507059e+37 }
 0x5d2   : > { %v1535_v4 = vmul.f32 %v1456_v55, %v2351_v36  ;;  %v1475_v35 = vsub.f32 1.0, %v1474_v63  ;;  %v1489_v13 = vmul.f32 %v1830_v11, %v2572_v40  ;;  %v1485_v36 = vor.u32 1.1754944e-38, %v1484_v27 }
 0x5d3   : > { %v1466_v31 = vsel %vm1465_vm5, %v1826_v38, %v1462_v32  ;;  %vm1494_vm13 = vweird.f32 %v1830_v11 }
 0x5d4   : > { %v1471_v23 = vsel %vm1468_vm6, %v1470_v19, %v1466_v31  ;;  %v1476_v39 = vmul.f32 %v1828_v22, %v1475_v35  ;;  %v1543_v6 = vadd.f32 %v1535_v4, %v2218_v49  ;;  %v1490_v46 = vsub.f32 1.0, %v1489_v13  ;;  %vm1495_vm0 = vmor %vm1493_vm15, %vm1494_vm13 }
 0x5d5   : > { %v1536_v21 = vmul.f32 %v1471_v23, %v2355_v18 }
 0x5d6   : > { %v1477_v33 = vadd.f32 %v1828_v22, %v1476_v39  ;;  %v1491_v17 = vmul.f32 %v1830_v11, %v1490_v46 }
 0x5d7   : > { %v1544_v60 = vadd.f32 %v1536_v21, %v2221_v16 }
 0x5d8   : > { %v1481_v54 = vsel %vm1480_vm12, %v1828_v22, %v1477_v33  ;;  %v1492_v28 = vadd.f32 %v1830_v11, %v1491_v17 }
 0x5d9   : > { %v1550_v18 = vpack.c.bf16 %v1544_v60, %v1543_v6  ;;  %v1486_v49 = vsel %vm1483_vm14, %v1485_v36, %v1481_v54 }
 0x5da   : > { %v1537_v9 = vmul.f32 %v1486_v49, %v2325_v41  ;;  %v1496_v5 = vsel %vm1495_vm0, %v1830_v11, %v1492_v28 }
 0x5db   : > { %1554 = vst [vmem:[%s2555_s21 + $0x8] sm:$0xff] %v1550_v18  ;;  %v1501_v16 = vsel %vm1498_vm1, %v1500_v59, %v1496_v5 }
 0x5dc   : > { %v1538_v1 = vmul.f32 %v1501_v16, %v2329_v0  ;;  %v1545_v62 = vadd.f32 %v1537_v9, %v2170_v53 }
 0x5de   : > { %v1546_v48 = vadd.f32 %v1538_v1, %v2173_v57 }
 0x5e0   : > { %v1551_v56 = vpack.c.bf16 %v1546_v48, %v1545_v62 }
 0x5e2   : > { %1555 = vst [vmem:[%s2555_s21 + $0x10] sm:$0xff] %v1551_v56 }
 0x5e3 PF: > { %s17_s24 = sadd.s32 1, %s1837_s24  }
 0x5e4   : > { %p14_p4 = scmp.ge.s32.totalorder %s17_s24, 6  }
 0x5e6   :  { %16 = sbr.rel (!%p14_p4) target bundleno = 1 (0x1), region = 83 }

</bundles_post_ra>
